<compile_context>
chip_gen: v6e
topology: v6e:2x2x1
jax: 0.10.0
libtpu: 0.0.40
codegen_flags: <defaults>
</compile_context>

<pallas_src>
import functools

import jax
import jax.numpy as jnp
from jax.experimental import pallas as pl
from jax.experimental.pallas import tpu as pltpu


def mha_kernel(x_ref, wq_ref, wk_ref, wv_ref, bq_ref, bk_ref, bv_ref,
               wp_ref, bp_ref, o_ref, slab_ref, *acc_refs,
               num_groups, heads_per_group, head_dim, weights_resident):
    ht = pl.program_id(1)
    # Weight-stack block index: if the whole stack is resident (constant index map)
    # pick group ht dynamically; otherwise the BlockSpec already selected the group.
    g = ht if weights_resident else 0

    bt, n, c = x_ref.shape
    r = bt * n
    dh = head_dim

    x2 = x_ref[...].reshape(r, c)                               # (R, C) bf16, no cast

    # Wide (Th*Dh lanes) projection matmuls; softmax scale already folded into wq/bq.
    q = jnp.dot(x2, wq_ref[g], preferred_element_type=jnp.float32) + bq_ref[g]
    k = jnp.dot(x2, wk_ref[g], preferred_element_type=jnp.float32) + bk_ref[g]
    v = jnp.dot(x2, wv_ref[g], preferred_element_type=jnp.float32) + bv_ref[g]
    q = q.astype(jnp.bfloat16)
    k = k.astype(jnp.bfloat16)
    v = v.astype(jnp.bfloat16)

    # Per-head attention within the group (static unroll; Th is small).
    # TODO(synk): add KV-block tiling (online softmax) for very long N; the full
    # (Bt, N, N) f32 score matrix is materialized per head here.
    # TODO(synk): attn_drop / proj_drop are identity in eval mode; dropout omitted.
    for hh in range(heads_per_group):
        sl = slice(hh * dh, (hh + 1) * dh)
        qh = q[:, sl].reshape(bt, n, dh)
        kh = k[:, sl].reshape(bt, n, dh)
        vh = v[:, sl].reshape(bt, n, dh)
        s = jnp.einsum('bnd,bmd->bnm', qh, kh,
                       preferred_element_type=jnp.float32)      # (Bt, N, N) f32
        s = s - jnp.max(s, axis=-1, keepdims=True)
        p = jnp.exp(s)
        denom = jnp.sum(p, axis=-1, keepdims=True)              # (Bt, N, 1)
        ctx = jnp.einsum('bnm,bmd->bnd', p.astype(jnp.bfloat16), vh,
                         preferred_element_type=jnp.float32)    # unnormalized ctx
        # Deferred softmax normalization: Bt*N*Dh multiplies instead of Bt*N*N.
        ctx = ctx * pl.reciprocal(denom, approx=True)
        slab_ref[:, sl] = ctx.reshape(r, dh).astype(slab_ref.dtype)

    # One out-projection per head group: (R, Th*Dh) @ (Th*Dh, C), full-depth K.
    part = jnp.dot(slab_ref[...], wp_ref[g], preferred_element_type=jnp.float32)

    if num_groups == 1:
        o_ref[...] = (part + bp_ref[...]).reshape(bt, n, c).astype(o_ref.dtype)
    else:
        acc_ref = acc_refs[0]

        @pl.when(ht == 0)
        def _():
            acc_ref[...] = part

        @pl.when(ht != 0)
        def _():
            acc_ref[...] = acc_ref[...] + part

        @pl.when(ht == num_groups - 1)
        def _():
            o_ref[...] = (acc_ref[...] + bp_ref[...]).reshape(bt, n, c).astype(o_ref.dtype)


def multi_head_attention(x, w_qkv, b_qkv, w_proj, b_proj, *, num_heads=8,
                         block_b=None):
    """x: (B, N, C).  Weights in torch nn.Linear layout:
       w_qkv (3C, C), b_qkv (3C,), w_proj (C, C), b_proj (C,).
       attn_drop / proj_drop are identity (eval mode)."""
    B, N, C = x.shape
    H = num_heads
    assert C % H == 0, "dim must be divisible by num_heads"
    Dh = C // H
    scale = Dh ** (-0.5)
    out_dtype = x.dtype

    # --- head grouping: Th*Dh >= 256 lanes where possible (full MXU width) ---------
    Th = max(1, min(H, 256 // max(Dh, 1)))
    while H % Th:
        Th -= 1
    G = H // Th
    Thd = Th * Dh

    # --- wrapper-side layout plumbing + bf16 casts + scale folding (done by XLA) ---
    def split_w(i):
        # torch Linear computes x @ W.T; heads g*Th..(g+1)*Th are lane-contiguous.
        w = w_qkv[i * C:(i + 1) * C, :].T.reshape(C, G, Thd).transpose(1, 0, 2)
        b = b_qkv[i * C:(i + 1) * C].reshape(G, 1, Thd)
        return w, b

    wq_g, bq_g = split_w(0)
    wk_g, bk_g = split_w(1)
    wv_g, bv_g = split_w(2)
    wq_g = (wq_g * scale).astype(jnp.bfloat16)          # fold softmax scale into q
    bq_g = (bq_g * scale).astype(jnp.bfloat16)
    wk_g = wk_g.astype(jnp.bfloat16)
    bk_g = bk_g.astype(jnp.bfloat16)
    wv_g = wv_g.astype(jnp.bfloat16)
    bv_g = bv_g.astype(jnp.bfloat16)
    wp_g = w_proj.T.reshape(G, Thd, C).astype(jnp.bfloat16)   # rows per head group
    bp = b_proj.reshape(1, C).astype(jnp.bfloat16)
    x_bf = x.astype(jnp.bfloat16)

    weight_bytes = 2 * (3 * C * C + C * C + 3 * C + C)              # bf16 bytes
    weights_resident = weight_bytes <= 8 * 1024 * 1024

    # --- batch tile: target ~512 MXU rows, bounded by ~48 MiB VMEM (v7x-safe) ------
    def vmem_bytes(bt):
        r = bt * N
        xo = r * C * (2 + jnp.dtype(out_dtype).itemsize)            # x + out blocks
        slab = r * Thd * 2
        acc = r * C * 4 if G > 1 else 0
        qkv = 3 * r * Thd * (4 + 2)                                 # f32 + bf16 copies
        scores = bt * N * N * 4 * 2                                 # s and p (f32)
        wblk = (3 * C * Thd + Thd * C) * 2 * (G if weights_resident else 1)
        return 2 * xo + slab + acc + qkv + scores + 2 * wblk

    if block_b is None:
        block_b = max(1, min(B, pl.cdiv(512, N)))
        while B % block_b:
            block_b -= 1
        while block_b > 1 and vmem_bytes(block_b) > 48 * 1024 * 1024:
            block_b -= 1
            while B % block_b:
                block_b -= 1
        # keep >= 2 batch-tile iterations so both TensorCores get work (v7x megacore)
        while block_b > 1 and B // block_b < 2:
            block_b -= 1
            while B % block_b:
                block_b -= 1
    Bt = block_b
    R = Bt * N

    vmem_limit = int(min(64 * 1024 * 1024,
                         max(32 * 1024 * 1024, int(1.3 * vmem_bytes(Bt)))))

    if weights_resident:
        widx = lambda b, h: (0, 0, 0)        # DMA once, stay VMEM-resident
        gdim = G
    else:
        widx = lambda b, h: (h, 0, 0)        # stream one head-group block per step
        gdim = 1

    in_specs = [
        pl.BlockSpec((Bt, N, C), lambda b, h: (b, 0, 0)),   # x (constant over h)
        pl.BlockSpec((gdim, C, Thd), widx),                 # Wq (scale folded)
        pl.BlockSpec((gdim, C, Thd), widx),                 # Wk
        pl.BlockSpec((gdim, C, Thd), widx),                 # Wv
        pl.BlockSpec((gdim, 1, Thd), widx),                 # bq (scale folded)
        pl.BlockSpec((gdim, 1, Thd), widx),                 # bk
        pl.BlockSpec((gdim, 1, Thd), widx),                 # bv
        pl.BlockSpec((gdim, Thd, C), widx),                 # Wproj rows per group
        pl.BlockSpec((1, C), lambda b, h: (0, 0)),          # bproj
    ]

    scratch = [pltpu.VMEM((R, Thd), jnp.bfloat16)]          # per-group ctx slab
    if G > 1:
        scratch.append(pltpu.VMEM((R, C), jnp.float32))     # out-proj accumulator

    kernel = functools.partial(mha_kernel, num_groups=G, heads_per_group=Th,
                               head_dim=Dh, weights_resident=weights_resident)

    grid_spec = pltpu.PrefetchScalarGridSpec(
        num_scalar_prefetch=0,
        grid=(B // Bt, G),                                  # head groups = reduction
        in_specs=in_specs,
        out_specs=pl.BlockSpec((Bt, N, C), lambda b, h: (b, 0, 0)),
        scratch_shapes=scratch,
    )

    flops = int(2 * B * N * C * (3 * C)      # qkv projections
                + 4 * B * H * N * N * Dh     # q@k.T and attn@v
                + 2 * B * N * C * C)         # output projection
    w_stream = weight_bytes if weights_resident else weight_bytes * (B // Bt)
    bytes_accessed = int(2 * x.size                                    # bf16 x in
                         + jnp.dtype(out_dtype).itemsize * B * N * C   # out
                         + w_stream)                                   # weight traffic
    cost = pl.CostEstimate(flops=flops,
                           transcendentals=int(B * H * N * N),
                           bytes_accessed=bytes_accessed)

    return pl.pallas_call(
        kernel,
        out_shape=jax.ShapeDtypeStruct((B, N, C), out_dtype),
        grid_spec=grid_spec,
        compiler_params=pltpu.CompilerParams(
            dimension_semantics=("parallel", "arbitrary"),
            vmem_limit_bytes=vmem_limit),
        cost_estimate=cost,
    )(x_bf, wq_g, wk_g, wv_g, bq_g, bk_g, bv_g, wp_g, bp)


def mha_reference(x, w_qkv, b_qkv, w_proj, b_proj, *, num_heads=8):
    """Pure-JAX f32 reference matching the torch module's forward semantics."""
    B, N, C = x.shape
    H = num_heads
    Dh = C // H
    scale = Dh ** (-0.5)
    qkv = x @ w_qkv.T + b_qkv                                  # (B, N, 3C)
    qkv = qkv.reshape(B, N, 3, H, Dh).transpose(2, 0, 3, 1, 4)
    q, k, v = qkv[0], qkv[1], qkv[2]                           # (B, H, N, Dh)
    attn = jnp.einsum('bhnd,bhmd->bhnm', q, k) * scale
    attn = jax.nn.softmax(attn, axis=-1)
    ctx = jnp.einsum('bhnm,bhmd->bhnd', attn, v)
    ctx = ctx.transpose(0, 2, 1, 3).reshape(B, N, C)
    return ctx @ w_proj.T + b_proj


if __name__ == "__main__":
    B, N, C = 2, 16, 32          # batch, sequence ("embed_dim" in torch code), dim
    NUM_HEADS = 8

    key = jax.random.PRNGKey(0)
    kx, kw1, kb1, kw2, kb2 = jax.random.split(key, 5)

    x = jax.random.normal(kx, (B, N, C), dtype=jnp.float32)
    # torch nn.Linear layout: weight (out_features, in_features), bias (out_features,)
    w_qkv = jax.random.normal(kw1, (3 * C, C), dtype=jnp.float32) * 0.05
    b_qkv = jax.random.normal(kb1, (3 * C,), dtype=jnp.float32) * 0.05
    w_proj = jax.random.normal(kw2, (C, C), dtype=jnp.float32) * 0.05
    b_proj = jax.random.normal(kb2, (C,), dtype=jnp.float32) * 0.05

    out = multi_head_attention(x, w_qkv, b_qkv, w_proj, b_proj, num_heads=NUM_HEADS)
    out = jax.block_until_ready(out)

    ref = mha_reference(x, w_qkv, b_qkv, w_proj, b_proj, num_heads=NUM_HEADS)
    assert out.shape == (B, N, C)
    # bf16 MXU matmuls (f32 accumulation) + approx reciprocal => loosened tolerance.
    assert jnp.allclose(out, ref, atol=1e-2, rtol=1e-2), "mismatch vs JAX reference"

    print("KERNEL_OK")
</pallas_src>

<mosaic_0001>
module attributes {stable_mosaic.version = 11 : i64} {
  func.func @mha_kernel(%arg0: i32, %arg1: i32, %arg2: memref<1x16x32xbf16, #tpu.memory_space<vmem>>, %arg3: memref<1x32x32xbf16, #tpu.memory_space<vmem>>, %arg4: memref<1x32x32xbf16, #tpu.memory_space<vmem>>, %arg5: memref<1x32x32xbf16, #tpu.memory_space<vmem>>, %arg6: memref<1x1x32xbf16, #tpu.memory_space<vmem>>, %arg7: memref<1x1x32xbf16, #tpu.memory_space<vmem>>, %arg8: memref<1x1x32xbf16, #tpu.memory_space<vmem>>, %arg9: memref<1x32x32xbf16, #tpu.memory_space<vmem>>, %arg10: memref<1x32xbf16, #tpu.memory_space<vmem>>, %arg11: memref<1x16x32xf32, #tpu.memory_space<vmem>>, %arg12: memref<16x32xbf16, #tpu.memory_space<vmem>>) attributes {dimension_semantics = [#tpu.dimension_semantics<parallel>, #tpu.dimension_semantics<arbitrary>], iteration_bounds = array<i64: 2, 1>, scalar_prefetch = 0 : i64, scratch_operands = 1 : i64, tpu.core_type = #tpu.core_type<tc>, window_params = [{transform_indices = @transform_0, window_bounds = array<i64: 1, 16, 32>}, {pipeline_mode = #tpu.pipeline_mode<synchronous>, transform_indices = @transform_1, window_bounds = array<i64: 1, 32, 32>}, {pipeline_mode = #tpu.pipeline_mode<synchronous>, transform_indices = @transform_2, window_bounds = array<i64: 1, 32, 32>}, {pipeline_mode = #tpu.pipeline_mode<synchronous>, transform_indices = @transform_3, window_bounds = array<i64: 1, 32, 32>}, {pipeline_mode = #tpu.pipeline_mode<synchronous>, transform_indices = @transform_4, window_bounds = array<i64: 1, 1, 32>}, {pipeline_mode = #tpu.pipeline_mode<synchronous>, transform_indices = @transform_5, window_bounds = array<i64: 1, 1, 32>}, {pipeline_mode = #tpu.pipeline_mode<synchronous>, transform_indices = @transform_6, window_bounds = array<i64: 1, 1, 32>}, {pipeline_mode = #tpu.pipeline_mode<synchronous>, transform_indices = @transform_7, window_bounds = array<i64: 1, 32, 32>}, {pipeline_mode = #tpu.pipeline_mode<synchronous>, transform_indices = @transform_8, window_bounds = array<i64: 1, 32>}, {transform_indices = @transform_9, window_bounds = array<i64: 1, 16, 32>}]} {
    %c0 = arith.constant 0 : index
    %c0_0 = arith.constant 0 : index
    %c0_1 = arith.constant 0 : index
    %0 = vector.load %arg2[%c0, %c0_0, %c0_1] : memref<1x16x32xbf16, #tpu.memory_space<vmem>>, vector<1x16x32xbf16>
    %1 = vector.shape_cast %0 : vector<1x16x32xbf16> to vector<16x32xbf16>
    %2 = arith.index_cast %arg1 : i32 to index
    %c0_2 = arith.constant 0 : index
    %c0_3 = arith.constant 0 : index
    %3 = vector.load %arg3[%2, %c0_2, %c0_3] : memref<1x32x32xbf16, #tpu.memory_space<vmem>>, vector<1x32x32xbf16>
    %4 = vector.shape_cast %3 : vector<1x32x32xbf16> to vector<32x32xbf16>
    %cst = arith.constant dense<0.000000e+00> : vector<16x32xf32>
    %5 = tpu.matmul %1, %4, %cst {dimension_numbers = #tpu.dot_dimension_numbers<[1], [0], [0], [1], [0, 0, 1, 1], [], []>} : vector<16x32xbf16>, vector<32x32xbf16>, vector<16x32xf32> -> vector<16x32xf32>
    %6 = arith.index_cast %arg1 : i32 to index
    %c0_4 = arith.constant 0 : index
    %c0_5 = arith.constant 0 : index
    %7 = vector.load %arg6[%6, %c0_4, %c0_5] : memref<1x1x32xbf16, #tpu.memory_space<vmem>>, vector<1x1x32xbf16>
    %8 = vector.shape_cast %7 : vector<1x1x32xbf16> to vector<1x32xbf16>
    %9 = arith.extf %8 : vector<1x32xbf16> to vector<1x32xf32>
    %10 = vector.broadcast %9 : vector<1x32xf32> to vector<16x32xf32>
    %11 = arith.addf %5, %10 : vector<16x32xf32>
    %12 = arith.index_cast %arg1 : i32 to index
    %c0_6 = arith.constant 0 : index
    %c0_7 = arith.constant 0 : index
    %13 = vector.load %arg4[%12, %c0_6, %c0_7] : memref<1x32x32xbf16, #tpu.memory_space<vmem>>, vector<1x32x32xbf16>
    %14 = vector.shape_cast %13 : vector<1x32x32xbf16> to vector<32x32xbf16>
    %cst_8 = arith.constant dense<0.000000e+00> : vector<16x32xf32>
    %15 = tpu.matmul %1, %14, %cst_8 {dimension_numbers = #tpu.dot_dimension_numbers<[1], [0], [0], [1], [0, 0, 1, 1], [], []>} : vector<16x32xbf16>, vector<32x32xbf16>, vector<16x32xf32> -> vector<16x32xf32>
    %16 = arith.index_cast %arg1 : i32 to index
    %c0_9 = arith.constant 0 : index
    %c0_10 = arith.constant 0 : index
    %17 = vector.load %arg7[%16, %c0_9, %c0_10] : memref<1x1x32xbf16, #tpu.memory_space<vmem>>, vector<1x1x32xbf16>
    %18 = vector.shape_cast %17 : vector<1x1x32xbf16> to vector<1x32xbf16>
    %19 = arith.extf %18 : vector<1x32xbf16> to vector<1x32xf32>
    %20 = vector.broadcast %19 : vector<1x32xf32> to vector<16x32xf32>
    %21 = arith.addf %15, %20 : vector<16x32xf32>
    %22 = arith.index_cast %arg1 : i32 to index
    %c0_11 = arith.constant 0 : index
    %c0_12 = arith.constant 0 : index
    %23 = vector.load %arg5[%22, %c0_11, %c0_12] : memref<1x32x32xbf16, #tpu.memory_space<vmem>>, vector<1x32x32xbf16>
    %24 = vector.shape_cast %23 : vector<1x32x32xbf16> to vector<32x32xbf16>
    %cst_13 = arith.constant dense<0.000000e+00> : vector<16x32xf32>
    %25 = tpu.matmul %1, %24, %cst_13 {dimension_numbers = #tpu.dot_dimension_numbers<[1], [0], [0], [1], [0, 0, 1, 1], [], []>} : vector<16x32xbf16>, vector<32x32xbf16>, vector<16x32xf32> -> vector<16x32xf32>
    %26 = arith.index_cast %arg1 : i32 to index
    %c0_14 = arith.constant 0 : index
    %c0_15 = arith.constant 0 : index
    %27 = vector.load %arg8[%26, %c0_14, %c0_15] : memref<1x1x32xbf16, #tpu.memory_space<vmem>>, vector<1x1x32xbf16>
    %28 = vector.shape_cast %27 : vector<1x1x32xbf16> to vector<1x32xbf16>
    %29 = arith.extf %28 : vector<1x32xbf16> to vector<1x32xf32>
    %30 = vector.broadcast %29 : vector<1x32xf32> to vector<16x32xf32>
    %31 = arith.addf %25, %30 : vector<16x32xf32>
    %32 = arith.truncf %11 : vector<16x32xf32> to vector<16x32xbf16>
    %33 = arith.truncf %21 : vector<16x32xf32> to vector<16x32xbf16>
    %34 = arith.truncf %31 : vector<16x32xf32> to vector<16x32xbf16>
    %35 = vector.extract_strided_slice %32 {offsets = [0, 0], sizes = [16, 4], strides = [1, 1]} : vector<16x32xbf16> to vector<16x4xbf16>
    %36 = vector.shape_cast %35 : vector<16x4xbf16> to vector<1x16x4xbf16>
    %37 = vector.extract_strided_slice %33 {offsets = [0, 0], sizes = [16, 4], strides = [1, 1]} : vector<16x32xbf16> to vector<16x4xbf16>
    %38 = vector.shape_cast %37 : vector<16x4xbf16> to vector<1x16x4xbf16>
    %39 = vector.extract_strided_slice %34 {offsets = [0, 0], sizes = [16, 4], strides = [1, 1]} : vector<16x32xbf16> to vector<16x4xbf16>
    %40 = vector.shape_cast %39 : vector<16x4xbf16> to vector<1x16x4xbf16>
    "tpu.trace_start"() <{level = 10 : i32, message = "bnd,bmd->bnm"}> : () -> ()
    %cst_16 = arith.constant dense<0.000000e+00> : vector<1x16x16xf32>
    %41 = tpu.matmul %36, %38, %cst_16 {dimension_numbers = #tpu.dot_dimension_numbers<[2], [2], [1], [1], [0, 0, 0, 1, 1, 1], [0], [0]>} : vector<1x16x4xbf16>, vector<1x16x4xbf16>, vector<1x16x16xf32> -> vector<1x16x16xf32>
    "tpu.trace_stop"() : () -> ()
    %cst_17 = arith.constant dense<0xFF800000> : vector<1x16xf32>
    %42 = vector.multi_reduction <maximumf>, %41, %cst_17 [2] : vector<1x16x16xf32> to vector<1x16xf32>
    %43 = vector.shape_cast %42 : vector<1x16xf32> to vector<1x16x1xf32>
    %44 = vector.broadcast %43 : vector<1x16x1xf32> to vector<1x16x16xf32>
    %45 = arith.subf %41, %44 : vector<1x16x16xf32>
    %46 = math.exp %45 : vector<1x16x16xf32>
    %cst_18 = arith.constant dense<0.000000e+00> : vector<1x16xf32>
    %47 = vector.multi_reduction <add>, %46, %cst_18 [2] : vector<1x16x16xf32> to vector<1x16xf32>
    %48 = vector.shape_cast %47 : vector<1x16xf32> to vector<1x16x1xf32>
    %49 = arith.truncf %46 : vector<1x16x16xf32> to vector<1x16x16xbf16>
    "tpu.trace_start"() <{level = 10 : i32, message = "bnm,bmd->bnd"}> : () -> ()
    %cst_19 = arith.constant dense<0.000000e+00> : vector<1x16x4xf32>
    %50 = tpu.matmul %49, %40, %cst_19 {dimension_numbers = #tpu.dot_dimension_numbers<[2], [1], [1], [2], [0, 0, 0, 1, 1, 2], [0], [0]>} : vector<1x16x16xbf16>, vector<1x16x4xbf16>, vector<1x16x4xf32> -> vector<1x16x4xf32>
    "tpu.trace_stop"() : () -> ()
    %51 = tpu.reciprocal %48 {approx = true} : vector<1x16x1xf32> -> vector<1x16x1xf32>
    %52 = vector.broadcast %51 : vector<1x16x1xf32> to vector<1x16x4xf32>
    %53 = arith.mulf %50, %52 : vector<1x16x4xf32>
    %54 = vector.shape_cast %53 : vector<1x16x4xf32> to vector<16x4xf32>
    %55 = arith.truncf %54 : vector<16x4xf32> to vector<16x4xbf16>
    %c0_20 = arith.constant 0 : index
    %c0_21 = arith.constant 0 : index
    %56 = vector.load %arg12[%c0_20, %c0_21] : memref<16x32xbf16, #tpu.memory_space<vmem>>, vector<16x4xbf16>
    tpu.vector_store %arg12[%c0_20, %c0_21], %55 {strides = array<i32>} : memref<16x32xbf16, #tpu.memory_space<vmem>>, vector<16x4xbf16>,
    %57 = vector.extract_strided_slice %32 {offsets = [0, 4], sizes = [16, 4], strides = [1, 1]} : vector<16x32xbf16> to vector<16x4xbf16>
    %58 = vector.shape_cast %57 : vector<16x4xbf16> to vector<1x16x4xbf16>
    %59 = vector.extract_strided_slice %33 {offsets = [0, 4], sizes = [16, 4], strides = [1, 1]} : vector<16x32xbf16> to vector<16x4xbf16>
    %60 = vector.shape_cast %59 : vector<16x4xbf16> to vector<1x16x4xbf16>
    %61 = vector.extract_strided_slice %34 {offsets = [0, 4], sizes = [16, 4], strides = [1, 1]} : vector<16x32xbf16> to vector<16x4xbf16>
    %62 = vector.shape_cast %61 : vector<16x4xbf16> to vector<1x16x4xbf16>
    "tpu.trace_start"() <{level = 10 : i32, message = "bnd,bmd->bnm"}> : () -> ()
    %cst_22 = arith.constant dense<0.000000e+00> : vector<1x16x16xf32>
    %63 = tpu.matmul %58, %60, %cst_22 {dimension_numbers = #tpu.dot_dimension_numbers<[2], [2], [1], [1], [0, 0, 0, 1, 1, 1], [0], [0]>} : vector<1x16x4xbf16>, vector<1x16x4xbf16>, vector<1x16x16xf32> -> vector<1x16x16xf32>
    "tpu.trace_stop"() : () -> ()
    %cst_23 = arith.constant dense<0xFF800000> : vector<1x16xf32>
    %64 = vector.multi_reduction <maximumf>, %63, %cst_23 [2] : vector<1x16x16xf32> to vector<1x16xf32>
    %65 = vector.shape_cast %64 : vector<1x16xf32> to vector<1x16x1xf32>
    %66 = vector.broadcast %65 : vector<1x16x1xf32> to vector<1x16x16xf32>
    %67 = arith.subf %63, %66 : vector<1x16x16xf32>
    %68 = math.exp %67 : vector<1x16x16xf32>
    %cst_24 = arith.constant dense<0.000000e+00> : vector<1x16xf32>
    %69 = vector.multi_reduction <add>, %68, %cst_24 [2] : vector<1x16x16xf32> to vector<1x16xf32>
    %70 = vector.shape_cast %69 : vector<1x16xf32> to vector<1x16x1xf32>
    %71 = arith.truncf %68 : vector<1x16x16xf32> to vector<1x16x16xbf16>
    "tpu.trace_start"() <{level = 10 : i32, message = "bnm,bmd->bnd"}> : () -> ()
    %cst_25 = arith.constant dense<0.000000e+00> : vector<1x16x4xf32>
    %72 = tpu.matmul %71, %62, %cst_25 {dimension_numbers = #tpu.dot_dimension_numbers<[2], [1], [1], [2], [0, 0, 0, 1, 1, 2], [0], [0]>} : vector<1x16x16xbf16>, vector<1x16x4xbf16>, vector<1x16x4xf32> -> vector<1x16x4xf32>
    "tpu.trace_stop"() : () -> ()
    %73 = tpu.reciprocal %70 {approx = true} : vector<1x16x1xf32> -> vector<1x16x1xf32>
    %74 = vector.broadcast %73 : vector<1x16x1xf32> to vector<1x16x4xf32>
    %75 = arith.mulf %72, %74 : vector<1x16x4xf32>
    %76 = vector.shape_cast %75 : vector<1x16x4xf32> to vector<16x4xf32>
    %77 = arith.truncf %76 : vector<16x4xf32> to vector<16x4xbf16>
    %c0_26 = arith.constant 0 : index
    %c4 = arith.constant 4 : index
    %78 = vector.load %arg12[%c0_26, %c4] : memref<16x32xbf16, #tpu.memory_space<vmem>>, vector<16x4xbf16>
    tpu.vector_store %arg12[%c0_26, %c4], %77 {strides = array<i32>} : memref<16x32xbf16, #tpu.memory_space<vmem>>, vector<16x4xbf16>,
    %79 = vector.extract_strided_slice %32 {offsets = [0, 8], sizes = [16, 4], strides = [1, 1]} : vector<16x32xbf16> to vector<16x4xbf16>
    %80 = vector.shape_cast %79 : vector<16x4xbf16> to vector<1x16x4xbf16>
    %81 = vector.extract_strided_slice %33 {offsets = [0, 8], sizes = [16, 4], strides = [1, 1]} : vector<16x32xbf16> to vector<16x4xbf16>
    %82 = vector.shape_cast %81 : vector<16x4xbf16> to vector<1x16x4xbf16>
    %83 = vector.extract_strided_slice %34 {offsets = [0, 8], sizes = [16, 4], strides = [1, 1]} : vector<16x32xbf16> to vector<16x4xbf16>
    %84 = vector.shape_cast %83 : vector<16x4xbf16> to vector<1x16x4xbf16>
    "tpu.trace_start"() <{level = 10 : i32, message = "bnd,bmd->bnm"}> : () -> ()
    %cst_27 = arith.constant dense<0.000000e+00> : vector<1x16x16xf32>
    %85 = tpu.matmul %80, %82, %cst_27 {dimension_numbers = #tpu.dot_dimension_numbers<[2], [2], [1], [1], [0, 0, 0, 1, 1, 1], [0], [0]>} : vector<1x16x4xbf16>, vector<1x16x4xbf16>, vector<1x16x16xf32> -> vector<1x16x16xf32>
    "tpu.trace_stop"() : () -> ()
    %cst_28 = arith.constant dense<0xFF800000> : vector<1x16xf32>
    %86 = vector.multi_reduction <maximumf>, %85, %cst_28 [2] : vector<1x16x16xf32> to vector<1x16xf32>
    %87 = vector.shape_cast %86 : vector<1x16xf32> to vector<1x16x1xf32>
    %88 = vector.broadcast %87 : vector<1x16x1xf32> to vector<1x16x16xf32>
    %89 = arith.subf %85, %88 : vector<1x16x16xf32>
    %90 = math.exp %89 : vector<1x16x16xf32>
    %cst_29 = arith.constant dense<0.000000e+00> : vector<1x16xf32>
    %91 = vector.multi_reduction <add>, %90, %cst_29 [2] : vector<1x16x16xf32> to vector<1x16xf32>
    %92 = vector.shape_cast %91 : vector<1x16xf32> to vector<1x16x1xf32>
    %93 = arith.truncf %90 : vector<1x16x16xf32> to vector<1x16x16xbf16>
    "tpu.trace_start"() <{level = 10 : i32, message = "bnm,bmd->bnd"}> : () -> ()
    %cst_30 = arith.constant dense<0.000000e+00> : vector<1x16x4xf32>
    %94 = tpu.matmul %93, %84, %cst_30 {dimension_numbers = #tpu.dot_dimension_numbers<[2], [1], [1], [2], [0, 0, 0, 1, 1, 2], [0], [0]>} : vector<1x16x16xbf16>, vector<1x16x4xbf16>, vector<1x16x4xf32> -> vector<1x16x4xf32>
    "tpu.trace_stop"() : () -> ()
    %95 = tpu.reciprocal %92 {approx = true} : vector<1x16x1xf32> -> vector<1x16x1xf32>
    %96 = vector.broadcast %95 : vector<1x16x1xf32> to vector<1x16x4xf32>
    %97 = arith.mulf %94, %96 : vector<1x16x4xf32>
    %98 = vector.shape_cast %97 : vector<1x16x4xf32> to vector<16x4xf32>
    %99 = arith.truncf %98 : vector<16x4xf32> to vector<16x4xbf16>
    %c0_31 = arith.constant 0 : index
    %c8 = arith.constant 8 : index
    %100 = vector.load %arg12[%c0_31, %c8] : memref<16x32xbf16, #tpu.memory_space<vmem>>, vector<16x4xbf16>
    tpu.vector_store %arg12[%c0_31, %c8], %99 {strides = array<i32>} : memref<16x32xbf16, #tpu.memory_space<vmem>>, vector<16x4xbf16>,
    %101 = vector.extract_strided_slice %32 {offsets = [0, 12], sizes = [16, 4], strides = [1, 1]} : vector<16x32xbf16> to vector<16x4xbf16>
    %102 = vector.shape_cast %101 : vector<16x4xbf16> to vector<1x16x4xbf16>
    %103 = vector.extract_strided_slice %33 {offsets = [0, 12], sizes = [16, 4], strides = [1, 1]} : vector<16x32xbf16> to vector<16x4xbf16>
    %104 = vector.shape_cast %103 : vector<16x4xbf16> to vector<1x16x4xbf16>
    %105 = vector.extract_strided_slice %34 {offsets = [0, 12], sizes = [16, 4], strides = [1, 1]} : vector<16x32xbf16> to vector<16x4xbf16>
    %106 = vector.shape_cast %105 : vector<16x4xbf16> to vector<1x16x4xbf16>
    "tpu.trace_start"() <{level = 10 : i32, message = "bnd,bmd->bnm"}> : () -> ()
    %cst_32 = arith.constant dense<0.000000e+00> : vector<1x16x16xf32>
    %107 = tpu.matmul %102, %104, %cst_32 {dimension_numbers = #tpu.dot_dimension_numbers<[2], [2], [1], [1], [0, 0, 0, 1, 1, 1], [0], [0]>} : vector<1x16x4xbf16>, vector<1x16x4xbf16>, vector<1x16x16xf32> -> vector<1x16x16xf32>
    "tpu.trace_stop"() : () -> ()
    %cst_33 = arith.constant dense<0xFF800000> : vector<1x16xf32>
    %108 = vector.multi_reduction <maximumf>, %107, %cst_33 [2] : vector<1x16x16xf32> to vector<1x16xf32>
    %109 = vector.shape_cast %108 : vector<1x16xf32> to vector<1x16x1xf32>
    %110 = vector.broadcast %109 : vector<1x16x1xf32> to vector<1x16x16xf32>
    %111 = arith.subf %107, %110 : vector<1x16x16xf32>
    %112 = math.exp %111 : vector<1x16x16xf32>
    %cst_34 = arith.constant dense<0.000000e+00> : vector<1x16xf32>
    %113 = vector.multi_reduction <add>, %112, %cst_34 [2] : vector<1x16x16xf32> to vector<1x16xf32>
    %114 = vector.shape_cast %113 : vector<1x16xf32> to vector<1x16x1xf32>
    %115 = arith.truncf %112 : vector<1x16x16xf32> to vector<1x16x16xbf16>
    "tpu.trace_start"() <{level = 10 : i32, message = "bnm,bmd->bnd"}> : () -> ()
    %cst_35 = arith.constant dense<0.000000e+00> : vector<1x16x4xf32>
    %116 = tpu.matmul %115, %106, %cst_35 {dimension_numbers = #tpu.dot_dimension_numbers<[2], [1], [1], [2], [0, 0, 0, 1, 1, 2], [0], [0]>} : vector<1x16x16xbf16>, vector<1x16x4xbf16>, vector<1x16x4xf32> -> vector<1x16x4xf32>
    "tpu.trace_stop"() : () -> ()
    %117 = tpu.reciprocal %114 {approx = true} : vector<1x16x1xf32> -> vector<1x16x1xf32>
    %118 = vector.broadcast %117 : vector<1x16x1xf32> to vector<1x16x4xf32>
    %119 = arith.mulf %116, %118 : vector<1x16x4xf32>
    %120 = vector.shape_cast %119 : vector<1x16x4xf32> to vector<16x4xf32>
    %121 = arith.truncf %120 : vector<16x4xf32> to vector<16x4xbf16>
    %c0_36 = arith.constant 0 : index
    %c12 = arith.constant 12 : index
    %122 = vector.load %arg12[%c0_36, %c12] : memref<16x32xbf16, #tpu.memory_space<vmem>>, vector<16x4xbf16>
    tpu.vector_store %arg12[%c0_36, %c12], %121 {strides = array<i32>} : memref<16x32xbf16, #tpu.memory_space<vmem>>, vector<16x4xbf16>,
    %123 = vector.extract_strided_slice %32 {offsets = [0, 16], sizes = [16, 4], strides = [1, 1]} : vector<16x32xbf16> to vector<16x4xbf16>
    %124 = vector.shape_cast %123 : vector<16x4xbf16> to vector<1x16x4xbf16>
    %125 = vector.extract_strided_slice %33 {offsets = [0, 16], sizes = [16, 4], strides = [1, 1]} : vector<16x32xbf16> to vector<16x4xbf16>
    %126 = vector.shape_cast %125 : vector<16x4xbf16> to vector<1x16x4xbf16>
    %127 = vector.extract_strided_slice %34 {offsets = [0, 16], sizes = [16, 4], strides = [1, 1]} : vector<16x32xbf16> to vector<16x4xbf16>
    %128 = vector.shape_cast %127 : vector<16x4xbf16> to vector<1x16x4xbf16>
    "tpu.trace_start"() <{level = 10 : i32, message = "bnd,bmd->bnm"}> : () -> ()
    %cst_37 = arith.constant dense<0.000000e+00> : vector<1x16x16xf32>
    %129 = tpu.matmul %124, %126, %cst_37 {dimension_numbers = #tpu.dot_dimension_numbers<[2], [2], [1], [1], [0, 0, 0, 1, 1, 1], [0], [0]>} : vector<1x16x4xbf16>, vector<1x16x4xbf16>, vector<1x16x16xf32> -> vector<1x16x16xf32>
    "tpu.trace_stop"() : () -> ()
    %cst_38 = arith.constant dense<0xFF800000> : vector<1x16xf32>
    %130 = vector.multi_reduction <maximumf>, %129, %cst_38 [2] : vector<1x16x16xf32> to vector<1x16xf32>
    %131 = vector.shape_cast %130 : vector<1x16xf32> to vector<1x16x1xf32>
    %132 = vector.broadcast %131 : vector<1x16x1xf32> to vector<1x16x16xf32>
    %133 = arith.subf %129, %132 : vector<1x16x16xf32>
    %134 = math.exp %133 : vector<1x16x16xf32>
    %cst_39 = arith.constant dense<0.000000e+00> : vector<1x16xf32>
    %135 = vector.multi_reduction <add>, %134, %cst_39 [2] : vector<1x16x16xf32> to vector<1x16xf32>
    %136 = vector.shape_cast %135 : vector<1x16xf32> to vector<1x16x1xf32>
    %137 = arith.truncf %134 : vector<1x16x16xf32> to vector<1x16x16xbf16>
    "tpu.trace_start"() <{level = 10 : i32, message = "bnm,bmd->bnd"}> : () -> ()
    %cst_40 = arith.constant dense<0.000000e+00> : vector<1x16x4xf32>
    %138 = tpu.matmul %137, %128, %cst_40 {dimension_numbers = #tpu.dot_dimension_numbers<[2], [1], [1], [2], [0, 0, 0, 1, 1, 2], [0], [0]>} : vector<1x16x16xbf16>, vector<1x16x4xbf16>, vector<1x16x4xf32> -> vector<1x16x4xf32>
    "tpu.trace_stop"() : () -> ()
    %139 = tpu.reciprocal %136 {approx = true} : vector<1x16x1xf32> -> vector<1x16x1xf32>
    %140 = vector.broadcast %139 : vector<1x16x1xf32> to vector<1x16x4xf32>
    %141 = arith.mulf %138, %140 : vector<1x16x4xf32>
    %142 = vector.shape_cast %141 : vector<1x16x4xf32> to vector<16x4xf32>
    %143 = arith.truncf %142 : vector<16x4xf32> to vector<16x4xbf16>
    %c0_41 = arith.constant 0 : index
    %c16 = arith.constant 16 : index
    %144 = vector.load %arg12[%c0_41, %c16] : memref<16x32xbf16, #tpu.memory_space<vmem>>, vector<16x4xbf16>
    tpu.vector_store %arg12[%c0_41, %c16], %143 {strides = array<i32>} : memref<16x32xbf16, #tpu.memory_space<vmem>>, vector<16x4xbf16>,
    %145 = vector.extract_strided_slice %32 {offsets = [0, 20], sizes = [16, 4], strides = [1, 1]} : vector<16x32xbf16> to vector<16x4xbf16>
    %146 = vector.shape_cast %145 : vector<16x4xbf16> to vector<1x16x4xbf16>
    %147 = vector.extract_strided_slice %33 {offsets = [0, 20], sizes = [16, 4], strides = [1, 1]} : vector<16x32xbf16> to vector<16x4xbf16>
    %148 = vector.shape_cast %147 : vector<16x4xbf16> to vector<1x16x4xbf16>
    %149 = vector.extract_strided_slice %34 {offsets = [0, 20], sizes = [16, 4], strides = [1, 1]} : vector<16x32xbf16> to vector<16x4xbf16>
    %150 = vector.shape_cast %149 : vector<16x4xbf16> to vector<1x16x4xbf16>
    "tpu.trace_start"() <{level = 10 : i32, message = "bnd,bmd->bnm"}> : () -> ()
    %cst_42 = arith.constant dense<0.000000e+00> : vector<1x16x16xf32>
    %151 = tpu.matmul %146, %148, %cst_42 {dimension_numbers = #tpu.dot_dimension_numbers<[2], [2], [1], [1], [0, 0, 0, 1, 1, 1], [0], [0]>} : vector<1x16x4xbf16>, vector<1x16x4xbf16>, vector<1x16x16xf32> -> vector<1x16x16xf32>
    "tpu.trace_stop"() : () -> ()
    %cst_43 = arith.constant dense<0xFF800000> : vector<1x16xf32>
    %152 = vector.multi_reduction <maximumf>, %151, %cst_43 [2] : vector<1x16x16xf32> to vector<1x16xf32>
    %153 = vector.shape_cast %152 : vector<1x16xf32> to vector<1x16x1xf32>
    %154 = vector.broadcast %153 : vector<1x16x1xf32> to vector<1x16x16xf32>
    %155 = arith.subf %151, %154 : vector<1x16x16xf32>
    %156 = math.exp %155 : vector<1x16x16xf32>
    %cst_44 = arith.constant dense<0.000000e+00> : vector<1x16xf32>
    %157 = vector.multi_reduction <add>, %156, %cst_44 [2] : vector<1x16x16xf32> to vector<1x16xf32>
    %158 = vector.shape_cast %157 : vector<1x16xf32> to vector<1x16x1xf32>
    %159 = arith.truncf %156 : vector<1x16x16xf32> to vector<1x16x16xbf16>
    "tpu.trace_start"() <{level = 10 : i32, message = "bnm,bmd->bnd"}> : () -> ()
    %cst_45 = arith.constant dense<0.000000e+00> : vector<1x16x4xf32>
    %160 = tpu.matmul %159, %150, %cst_45 {dimension_numbers = #tpu.dot_dimension_numbers<[2], [1], [1], [2], [0, 0, 0, 1, 1, 2], [0], [0]>} : vector<1x16x16xbf16>, vector<1x16x4xbf16>, vector<1x16x4xf32> -> vector<1x16x4xf32>
    "tpu.trace_stop"() : () -> ()
    %161 = tpu.reciprocal %158 {approx = true} : vector<1x16x1xf32> -> vector<1x16x1xf32>
    %162 = vector.broadcast %161 : vector<1x16x1xf32> to vector<1x16x4xf32>
    %163 = arith.mulf %160, %162 : vector<1x16x4xf32>
    %164 = vector.shape_cast %163 : vector<1x16x4xf32> to vector<16x4xf32>
    %165 = arith.truncf %164 : vector<16x4xf32> to vector<16x4xbf16>
    %c0_46 = arith.constant 0 : index
    %c20 = arith.constant 20 : index
    %166 = vector.load %arg12[%c0_46, %c20] : memref<16x32xbf16, #tpu.memory_space<vmem>>, vector<16x4xbf16>
    tpu.vector_store %arg12[%c0_46, %c20], %165 {strides = array<i32>} : memref<16x32xbf16, #tpu.memory_space<vmem>>, vector<16x4xbf16>,
    %167 = vector.extract_strided_slice %32 {offsets = [0, 24], sizes = [16, 4], strides = [1, 1]} : vector<16x32xbf16> to vector<16x4xbf16>
    %168 = vector.shape_cast %167 : vector<16x4xbf16> to vector<1x16x4xbf16>
    %169 = vector.extract_strided_slice %33 {offsets = [0, 24], sizes = [16, 4], strides = [1, 1]} : vector<16x32xbf16> to vector<16x4xbf16>
    %170 = vector.shape_cast %169 : vector<16x4xbf16> to vector<1x16x4xbf16>
    %171 = vector.extract_strided_slice %34 {offsets = [0, 24], sizes = [16, 4], strides = [1, 1]} : vector<16x32xbf16> to vector<16x4xbf16>
    %172 = vector.shape_cast %171 : vector<16x4xbf16> to vector<1x16x4xbf16>
    "tpu.trace_start"() <{level = 10 : i32, message = "bnd,bmd->bnm"}> : () -> ()
    %cst_47 = arith.constant dense<0.000000e+00> : vector<1x16x16xf32>
    %173 = tpu.matmul %168, %170, %cst_47 {dimension_numbers = #tpu.dot_dimension_numbers<[2], [2], [1], [1], [0, 0, 0, 1, 1, 1], [0], [0]>} : vector<1x16x4xbf16>, vector<1x16x4xbf16>, vector<1x16x16xf32> -> vector<1x16x16xf32>
    "tpu.trace_stop"() : () -> ()
    %cst_48 = arith.constant dense<0xFF800000> : vector<1x16xf32>
    %174 = vector.multi_reduction <maximumf>, %173, %cst_48 [2] : vector<1x16x16xf32> to vector<1x16xf32>
    %175 = vector.shape_cast %174 : vector<1x16xf32> to vector<1x16x1xf32>
    %176 = vector.broadcast %175 : vector<1x16x1xf32> to vector<1x16x16xf32>
    %177 = arith.subf %173, %176 : vector<1x16x16xf32>
    %178 = math.exp %177 : vector<1x16x16xf32>
    %cst_49 = arith.constant dense<0.000000e+00> : vector<1x16xf32>
    %179 = vector.multi_reduction <add>, %178, %cst_49 [2] : vector<1x16x16xf32> to vector<1x16xf32>
    %180 = vector.shape_cast %179 : vector<1x16xf32> to vector<1x16x1xf32>
    %181 = arith.truncf %178 : vector<1x16x16xf32> to vector<1x16x16xbf16>
    "tpu.trace_start"() <{level = 10 : i32, message = "bnm,bmd->bnd"}> : () -> ()
    %cst_50 = arith.constant dense<0.000000e+00> : vector<1x16x4xf32>
    %182 = tpu.matmul %181, %172, %cst_50 {dimension_numbers = #tpu.dot_dimension_numbers<[2], [1], [1], [2], [0, 0, 0, 1, 1, 2], [0], [0]>} : vector<1x16x16xbf16>, vector<1x16x4xbf16>, vector<1x16x4xf32> -> vector<1x16x4xf32>
    "tpu.trace_stop"() : () -> ()
    %183 = tpu.reciprocal %180 {approx = true} : vector<1x16x1xf32> -> vector<1x16x1xf32>
    %184 = vector.broadcast %183 : vector<1x16x1xf32> to vector<1x16x4xf32>
    %185 = arith.mulf %182, %184 : vector<1x16x4xf32>
    %186 = vector.shape_cast %185 : vector<1x16x4xf32> to vector<16x4xf32>
    %187 = arith.truncf %186 : vector<16x4xf32> to vector<16x4xbf16>
    %c0_51 = arith.constant 0 : index
    %c24 = arith.constant 24 : index
    %188 = vector.load %arg12[%c0_51, %c24] : memref<16x32xbf16, #tpu.memory_space<vmem>>, vector<16x4xbf16>
    tpu.vector_store %arg12[%c0_51, %c24], %187 {strides = array<i32>} : memref<16x32xbf16, #tpu.memory_space<vmem>>, vector<16x4xbf16>,
    %189 = vector.extract_strided_slice %32 {offsets = [0, 28], sizes = [16, 4], strides = [1, 1]} : vector<16x32xbf16> to vector<16x4xbf16>
    %190 = vector.shape_cast %189 : vector<16x4xbf16> to vector<1x16x4xbf16>
    %191 = vector.extract_strided_slice %33 {offsets = [0, 28], sizes = [16, 4], strides = [1, 1]} : vector<16x32xbf16> to vector<16x4xbf16>
    %192 = vector.shape_cast %191 : vector<16x4xbf16> to vector<1x16x4xbf16>
    %193 = vector.extract_strided_slice %34 {offsets = [0, 28], sizes = [16, 4], strides = [1, 1]} : vector<16x32xbf16> to vector<16x4xbf16>
    %194 = vector.shape_cast %193 : vector<16x4xbf16> to vector<1x16x4xbf16>
    "tpu.trace_start"() <{level = 10 : i32, message = "bnd,bmd->bnm"}> : () -> ()
    %cst_52 = arith.constant dense<0.000000e+00> : vector<1x16x16xf32>
    %195 = tpu.matmul %190, %192, %cst_52 {dimension_numbers = #tpu.dot_dimension_numbers<[2], [2], [1], [1], [0, 0, 0, 1, 1, 1], [0], [0]>} : vector<1x16x4xbf16>, vector<1x16x4xbf16>, vector<1x16x16xf32> -> vector<1x16x16xf32>
    "tpu.trace_stop"() : () -> ()
    %cst_53 = arith.constant dense<0xFF800000> : vector<1x16xf32>
    %196 = vector.multi_reduction <maximumf>, %195, %cst_53 [2] : vector<1x16x16xf32> to vector<1x16xf32>
    %197 = vector.shape_cast %196 : vector<1x16xf32> to vector<1x16x1xf32>
    %198 = vector.broadcast %197 : vector<1x16x1xf32> to vector<1x16x16xf32>
    %199 = arith.subf %195, %198 : vector<1x16x16xf32>
    %200 = math.exp %199 : vector<1x16x16xf32>
    %cst_54 = arith.constant dense<0.000000e+00> : vector<1x16xf32>
    %201 = vector.multi_reduction <add>, %200, %cst_54 [2] : vector<1x16x16xf32> to vector<1x16xf32>
    %202 = vector.shape_cast %201 : vector<1x16xf32> to vector<1x16x1xf32>
    %203 = arith.truncf %200 : vector<1x16x16xf32> to vector<1x16x16xbf16>
    "tpu.trace_start"() <{level = 10 : i32, message = "bnm,bmd->bnd"}> : () -> ()
    %cst_55 = arith.constant dense<0.000000e+00> : vector<1x16x4xf32>
    %204 = tpu.matmul %203, %194, %cst_55 {dimension_numbers = #tpu.dot_dimension_numbers<[2], [1], [1], [2], [0, 0, 0, 1, 1, 2], [0], [0]>} : vector<1x16x16xbf16>, vector<1x16x4xbf16>, vector<1x16x4xf32> -> vector<1x16x4xf32>
    "tpu.trace_stop"() : () -> ()
    %205 = tpu.reciprocal %202 {approx = true} : vector<1x16x1xf32> -> vector<1x16x1xf32>
    %206 = vector.broadcast %205 : vector<1x16x1xf32> to vector<1x16x4xf32>
    %207 = arith.mulf %204, %206 : vector<1x16x4xf32>
    %208 = vector.shape_cast %207 : vector<1x16x4xf32> to vector<16x4xf32>
    %209 = arith.truncf %208 : vector<16x4xf32> to vector<16x4xbf16>
    %c0_56 = arith.constant 0 : index
    %c28 = arith.constant 28 : index
    %210 = vector.load %arg12[%c0_56, %c28] : memref<16x32xbf16, #tpu.memory_space<vmem>>, vector<16x4xbf16>
    tpu.vector_store %arg12[%c0_56, %c28], %209 {strides = array<i32>} : memref<16x32xbf16, #tpu.memory_space<vmem>>, vector<16x4xbf16>,
    %c0_57 = arith.constant 0 : index
    %c0_58 = arith.constant 0 : index
    %211 = vector.load %arg12[%c0_57, %c0_58] : memref<16x32xbf16, #tpu.memory_space<vmem>>, vector<16x32xbf16>
    %212 = arith.index_cast %arg1 : i32 to index
    %c0_59 = arith.constant 0 : index
    %c0_60 = arith.constant 0 : index
    %213 = vector.load %arg9[%212, %c0_59, %c0_60] : memref<1x32x32xbf16, #tpu.memory_space<vmem>>, vector<1x32x32xbf16>
    %214 = vector.shape_cast %213 : vector<1x32x32xbf16> to vector<32x32xbf16>
    %cst_61 = arith.constant dense<0.000000e+00> : vector<16x32xf32>
    %215 = tpu.matmul %211, %214, %cst_61 {dimension_numbers = #tpu.dot_dimension_numbers<[1], [0], [0], [1], [0, 0, 1, 1], [], []>} : vector<16x32xbf16>, vector<32x32xbf16>, vector<16x32xf32> -> vector<16x32xf32>
    %c0_62 = arith.constant 0 : index
    %c0_63 = arith.constant 0 : index
    %216 = vector.load %arg10[%c0_62, %c0_63] : memref<1x32xbf16, #tpu.memory_space<vmem>>, vector<1x32xbf16>
    %217 = arith.extf %216 : vector<1x32xbf16> to vector<1x32xf32>
    %218 = vector.broadcast %217 : vector<1x32xf32> to vector<16x32xf32>
    %219 = arith.addf %215, %218 : vector<16x32xf32>
    %220 = vector.shape_cast %219 : vector<16x32xf32> to vector<1x16x32xf32>
    %c0_64 = arith.constant 0 : index
    %c0_65 = arith.constant 0 : index
    %c0_66 = arith.constant 0 : index
    %221 = vector.load %arg11[%c0_64, %c0_65, %c0_66] : memref<1x16x32xf32, #tpu.memory_space<vmem>>, vector<1x16x32xf32>
    tpu.vector_store %arg11[%c0_64, %c0_65, %c0_66], %220 {strides = array<i32>} : memref<1x16x32xf32, #tpu.memory_space<vmem>>, vector<1x16x32xf32>,
    return
  }
  func.func @transform_0(%arg0: i32, %arg1: i32) -> (i32, i32, i32) {
    %c0_i32 = arith.constant 0 : i32
    %c0_i32_0 = arith.constant 0 : i32
    %c0_i32_1 = arith.constant 0 : i32
    return %arg0, %c0_i32, %c0_i32_0 : i32, i32, i32
  }
  func.func @transform_1(%arg0: i32, %arg1: i32) -> (i32, i32, i32) {
    %c0_i32 = arith.constant 0 : i32
    %c0_i32_0 = arith.constant 0 : i32
    %c0_i32_1 = arith.constant 0 : i32
    %c0_i32_2 = arith.constant 0 : i32
    return %c0_i32, %c0_i32_0, %c0_i32_1 : i32, i32, i32
  }
  func.func @transform_2(%arg0: i32, %arg1: i32) -> (i32, i32, i32) {
    %c0_i32 = arith.constant 0 : i32
    %c0_i32_0 = arith.constant 0 : i32
    %c0_i32_1 = arith.constant 0 : i32
    %c0_i32_2 = arith.constant 0 : i32
    return %c0_i32, %c0_i32_0, %c0_i32_1 : i32, i32, i32
  }
  func.func @transform_3(%arg0: i32, %arg1: i32) -> (i32, i32, i32) {
    %c0_i32 = arith.constant 0 : i32
    %c0_i32_0 = arith.constant 0 : i32
    %c0_i32_1 = arith.constant 0 : i32
    %c0_i32_2 = arith.constant 0 : i32
    return %c0_i32, %c0_i32_0, %c0_i32_1 : i32, i32, i32
  }
  func.func @transform_4(%arg0: i32, %arg1: i32) -> (i32, i32, i32) {
    %c0_i32 = arith.constant 0 : i32
    %c0_i32_0 = arith.constant 0 : i32
    %c0_i32_1 = arith.constant 0 : i32
    %c0_i32_2 = arith.constant 0 : i32
    return %c0_i32, %c0_i32_0, %c0_i32_1 : i32, i32, i32
  }
  func.func @transform_5(%arg0: i32, %arg1: i32) -> (i32, i32, i32) {
    %c0_i32 = arith.constant 0 : i32
    %c0_i32_0 = arith.constant 0 : i32
    %c0_i32_1 = arith.constant 0 : i32
    %c0_i32_2 = arith.constant 0 : i32
    return %c0_i32, %c0_i32_0, %c0_i32_1 : i32, i32, i32
  }
  func.func @transform_6(%arg0: i32, %arg1: i32) -> (i32, i32, i32) {
    %c0_i32 = arith.constant 0 : i32
    %c0_i32_0 = arith.constant 0 : i32
    %c0_i32_1 = arith.constant 0 : i32
    %c0_i32_2 = arith.constant 0 : i32
    return %c0_i32, %c0_i32_0, %c0_i32_1 : i32, i32, i32
  }
  func.func @transform_7(%arg0: i32, %arg1: i32) -> (i32, i32, i32) {
    %c0_i32 = arith.constant 0 : i32
    %c0_i32_0 = arith.constant 0 : i32
    %c0_i32_1 = arith.constant 0 : i32
    %c0_i32_2 = arith.constant 0 : i32
    return %c0_i32, %c0_i32_0, %c0_i32_1 : i32, i32, i32
  }
  func.func @transform_8(%arg0: i32, %arg1: i32) -> (i32, i32) {
    %c0_i32 = arith.constant 0 : i32
    %c0_i32_0 = arith.constant 0 : i32
    %c0_i32_1 = arith.constant 0 : i32
    return %c0_i32, %c0_i32_0 : i32, i32
  }
  func.func @transform_9(%arg0: i32, %arg1: i32) -> (i32, i32, i32) {
    %c0_i32 = arith.constant 0 : i32
    %c0_i32_0 = arith.constant 0 : i32
    %c0_i32_1 = arith.constant 0 : i32
    return %arg0, %c0_i32, %c0_i32_0 : i32, i32, i32
  }
}

</mosaic_0001>

<bundles_post_ra>
// kernel: tpu_custom_call.1
= control target key start
LH: loop header
LB: loop body
LE: loop exit
PB: predicated region body
PF: predicated region fallthrough
CT: control target
= control target key end

     0   :  { %s3176_s0 = inlined_call_operand.hbm [shape: bf16[2,16,32], index: 0, kind: input, shape index: {}]   ;;  %s3177_s1 = inlined_call_operand.hbm [shape: bf16[1,32,32], index: 1, kind: input, shape index: {}]   ;;  %s3178_s2 = inlined_call_operand.hbm [shape: bf16[1,32,32], index: 2, kind: input, shape index: {}]   ;;  %s3179_s3 = inlined_call_operand.hbm [shape: bf16[1,32,32], index: 3, kind: input, shape index: {}]   ;;  %s3180_s4 = inlined_call_operand.vmem [shape: bf16[1,1,32], index: 4, kind: input, shape index: {}]   ;;  %s3181_s5 = inlined_call_operand.vmem [shape: bf16[1,1,32], index: 5, kind: input, shape index: {}]   ;;  %s3182_s6 = inlined_call_operand.vmem [shape: bf16[1,1,32], index: 6, kind: input, shape index: {}]   ;;  %s3183_s7 = inlined_call_operand.hbm [shape: bf16[1,32,32], index: 7, kind: input, shape index: {}]   ;;  %s3184_s8 = inlined_call_operand.vmem [shape: bf16[1,32], index: 8, kind: input, shape index: {}]   ;;  %s3185_s9 = inlined_call_operand.hbm [shape: f32[2,16,32], index: 9, kind: output, shape index: {}]  }
   0x1   :  { %3189 = sst [smem:[#allocation18_spill]] %s3177_s1 }
   0x2   :  { %3190 = sst [smem:[#allocation19_spill]] %s3178_s2 }
   0x3   :  { %3191 = sst [smem:[#allocation20_spill]] %s3179_s3 }
   0x4   :  { %3192 = sst [smem:[#allocation21_spill]] %s3183_s7 }
   0x5   :  { %14 = vsyncpa [#allocation4], 0 }
   0x6   :  { %16 = vsyncpa [#allocation4 + $0x1], 0 }
   0x7   :  { %17 = vsyncpa [#allocation7], 0 }
   0x8   :  { %18 = vsyncpa [#allocation10], 0 }
   0x9   :  { %19 = vsyncpa [#allocation5], 0 }
   0xa   :  { %21 = vsyncpa [#allocation5 + $0x1], 0  ;;  %s2690_s30 = smov 0   ;;  %s2692_s10 = smov 0  }
   0xb   :  { %s2694_s11 = smov 0   ;;  %s2696_s12 = smov 0  }
   0xc   :  { %s2698_s13 = smov 0   ;;  %s2700_s14 = smov 0  }
   0xd LB: > { %s1938_s15 = sadd.s32 4294967295, %s2613_s14   ;;  %s1939_s16 = sadd.s32 4294967294, %s2613_s14   ;;  %s2613_s14 = sphi %s2700_s14, %s27_s14   ;;  %s2609_s13 = sphi %s2698_s13, %s3215_s13   ;;  %s2605_s12 = sphi %s2696_s12, %s3214_s12   ;;  %s2601_s11 = sphi %s2694_s11, %s3213_s11   ;;  %s2597_s10 = sphi %s2692_s10, %s3212_s10   ;;  %s2593_s30 = sphi %s2690_s30, %s3211_s30  }
   0xe   : > { %p59_p0 = scmp.ne.s32.totalorder %s2597_s10, %s2593_s30  ;;  %p2724_p1 = scmp.eq.s32.totalorder %s1938_s15, 0 }
   0xf   : > { %p2728_p2 = scmp.eq.s32.totalorder %s1938_s15, 1  ;;  %p257_p3 = scmp.eq.s32.totalorder %s1939_s16, 1 }
  0x10   : > { %p2734_p4 = por %p2724_p1, %p59_p0  ;;  %p1940_p5 = scmp.ge.s32.totalorder %s2613_s14, 1 }
  0x11   : > { %p2739_p6 = por %p257_p3, %p59_p0  ;;  %p264_p7 = scmp.lt.s32.totalorder %s2613_s14, 3 }
  0x12   : > { %s2615_s22 = smov [#allocation6]   ;;  %s2616_s25 = smov [#allocation9]  }
  0x13   : > { %s3196_s20 = scalar_select %p2739_p6, 1, 0 }
  0x14   : > { %p2744_p8 = pnand %p1940_p5, %p264_p7  ;;  %s276_s23 = sshll.u32 %s2615_s22, 4  ;;  %s277_s23 = int_to_ptr.vmem [resolvable:$true] %s276_s23 }
  0x15   : > { %3197 = sst [smem:[#allocation17_spill]] %s3196_s20  ;;  %s302_s26 = sshll.u32 %s2616_s25, 4  ;;  %s303_s26 = int_to_ptr.vmem [resolvable:$true] %s302_s26 }
  0x16   : > { %p2217_p9 = pneg %p2744_p8  ;;  %s2617_s27 = smov [#allocation8]  }
  0x17   : > { %s289_s28 = sshll.u32 %s2617_s27, 4  ;;  %s2404_s29 = scalar_lea.vmem %s277_s23, 256  ;;  %s290_s28 = int_to_ptr.vmem [resolvable:$true] %s289_s28 }
  0x18   : > { %p2753_p11 = pnand %p2217_p9, %p2724_p1  ;;  %p2405_p13 = scmp.ne.s32.totalorder %s277_s23, %s2404_s29 }
  0x19   : > { %p2412_p5 = scmp.lt.s32.totalorder %s277_s23, %s277_s23  ;;  %p2413_p7 = scmp.lt.s32.totalorder %s2404_s29, %s2404_s29 }
  0x1a   : > { %p2395_p12 = pneg %p2753_p11 }
  0x1b   : > { %p2414_p9 = por %p2413_p7, %p2412_p5 }
  0x1c   : > { %p2407_p0 = pnand %p2405_p13, %p2395_p12 }
  0x1e   : > { %p2408_p3 = pneg %p2407_p0 }
  0x20   : > { %p2415_p10 = pnand %p2414_p9, %p2408_p3 }
  0x22   : > { %2418 = shalt.err (!%p2415_p10)
}
  0x23   : > { %s3187_s15 = smov 64   ;;  %s3188_s16 = smov 4  }
  0x24   : > { %s3200_s1 = sld [smem:[#allocation18_spill]]  ;;  %s2430_s27 = scalar_lea.vmem %s303_s26, 256 }
  0x25   : > { %p2431_p13 = scmp.ne.s32.totalorder %s303_s26, %s2430_s27  ;;  %p2438_p3 = scmp.lt.s32.totalorder %s303_s26, %s303_s26 }
  0x26   : > { %p2439_p10 = scmp.lt.s32.totalorder %s2430_s27, %s2430_s27 }
  0x27   : > { %p2433_p0 = pnand %p2431_p13, %p2395_p12 }
  0x28   : > { %p2440_p7 = por %p2439_p10, %p2438_p3 }
  0x29   : > { %p2434_p5 = pneg %p2433_p0 }
  0x2a   : > { %2220 = dma.hbm_to_vmem [thread:$0]  (!%p2753_p11), %s3200_s1, 256, %s277_s23, [#allocation7], %s3187_s15, %s3187_s15, %s3188_s16  }
  0x2b   : > { %p2441_p9 = pnand %p2440_p7, %p2434_p5 }
  0x2d   : > { %2444 = shalt.err (!%p2441_p9)
}
  0x2e   : > { %s3201_s3 = sld [smem:[#allocation20_spill]]  ;;  %s2456_s23 = scalar_lea.vmem %s290_s28, 256 }
  0x2f   : > { %p2457_p6 = scmp.ne.s32.totalorder %s290_s28, %s2456_s23  ;;  %p2464_p3 = scmp.lt.s32.totalorder %s290_s28, %s290_s28 }
  0x30   : > { %p2465_p5 = scmp.lt.s32.totalorder %s2456_s23, %s2456_s23 }
  0x31   : > { %p2459_p13 = pnand %p2457_p6, %p2395_p12 }
  0x32   : > { %p2466_p10 = por %p2465_p5, %p2464_p3 }
  0x33   : > { %p2460_p0 = pneg %p2459_p13 }
  0x34   : > { %2226 = dma.hbm_to_vmem [thread:$0]  (!%p2753_p11), %s3201_s3, 256, %s303_s26, [#allocation10], %s3187_s15, %s3187_s15, %s3188_s16  }
  0x35   : > { %p2467_p7 = pnand %p2466_p10, %p2460_p0 }
  0x37   : > { %2470 = shalt.err (!%p2467_p7)
}
  0x38   : > { %s3202_s2 = sld [smem:[#allocation19_spill]]  ;;  %s2620_s26 = smov [#allocation11]  }
  0x39   : > { %s324_s25 = sshll.u32 %s2620_s26, 4  ;;  %s325_s25 = int_to_ptr.vmem [resolvable:$true] %s324_s25 }
  0x3a   : > { %s2482_s27 = scalar_lea.vmem %s325_s25, 256  ;;  %p2490_p0 = scmp.lt.s32.totalorder %s325_s25, %s325_s25 }
  0x3b   : > { %p2483_p6 = scmp.ne.s32.totalorder %s325_s25, %s2482_s27  ;;  %p2491_p3 = scmp.lt.s32.totalorder %s2482_s27, %s2482_s27 }
  0x3d   : > { %p2485_p9 = pnand %p2483_p6, %p2395_p12  ;;  %p2492_p5 = por %p2491_p3, %p2490_p0 }
  0x3e   : > { %2223 = dma.hbm_to_vmem [thread:$0]  (!%p2753_p11), %s3202_s2, 256, %s290_s28, [#allocation7], %s3187_s15, %s3187_s15, %s3188_s16  }
  0x3f   : > { %p2486_p13 = pneg %p2485_p9 }
  0x41   : > { %p2493_p10 = pnand %p2492_p5, %p2486_p13 }
  0x43   : > { %2496 = shalt.err (!%p2493_p10)
}
  0x44   : > { %s3203_s7 = sld [smem:[#allocation21_spill]]  ;;  %s39_s23 = sadd.s32 1, %s2609_s13 }
  0x45   : > { %s46_s24 = sadd.s32 1, %s2601_s11  ;;  %p41_p12 = scmp.ge.s32.totalorder %s39_s23, 2 }
  0x46   : > { %p53_p7 = scmp.ne.s32.totalorder %s2601_s11, %s2597_s10  ;;  %p54_p6 = scmp.eq.s32.totalorder %s2613_s14, 0 }
  0x47   : > { %p2242_p9 = scmp.lt.s32.totalorder %s2613_s14, 2  ;;  %s3217_s23 = smov (%p41_p12, %s39_s23), 0 }
  0x48   : > { %p55_p13 = por %p54_p6, %p53_p7  ;;  %p2813_p0 = por %p2728_p2, %p53_p7 }
  0x49   : > { %s43_s22 = ssub.s32 %s2609_s13, %s3217_s23  ;;  %s341_s26 = sand.u32 1, %s2601_s11  }
  0x4a   : > { %2229 = dma.hbm_to_vmem [thread:$0]  (!%p2753_p11), %s3203_s7, 256, %s325_s25, [#allocation10], %s3187_s15, %s3187_s15, %s3188_s16  }
  0x4b   : > { %p44_p3 = scmp.eq.s32.totalorder %s43_s22, 0  ;;  %s1946_s25 = sshll.u32 %s341_s26, 3 }
  0x4c   : > { %s2007_s27 = sshll.u32 %s2609_s13, 7  ;;  %s345_s1 = scalar_lea.vmem [#allocation3], %s1946_s25 }
  0x4d   : > { %s2822_s28 = scalar_select %p44_p3, %s2601_s11, %s46_s24  }
  0x4e   : > { %s351_s16 = scalar_lea.hbm %s3176_s0, %s2007_s27  ;;  %s352_s2 = sshll.u32 %s345_s1, 4  ;;  %s353_s2 = int_to_ptr.vmem [resolvable:$true] %s352_s2 }
  0x4f   : > { %p2829_p11 = pnand %p2242_p9, %p55_p13  ;;  %s342_s3 = scalar_lea.sflag [#allocation4], %s341_s26 }
  0x50   : > { %s2510_s22 = scalar_lea.vmem %s353_s2, 128  ;;  %s2621_s24 = smov [#allocation3]  }
  0x51   : > { %p2499_p2 = pneg %p2829_p11  ;;  %p2511_p5 = scmp.ne.s32.totalorder %s353_s2, %s2510_s22 }
  0x52   : > { %s2515_s7 = sshll.u32 %s2621_s24, 4  ;;  %s2516_s7 = int_to_ptr.vmem [resolvable:$false] %s2515_s7 }
  0x53   : > { %p2513_p10 = pnand %p2511_p5, %p2499_p2  ;;  %s2517_s15 = scalar_lea.vmem %s2516_s7, 256 }
  0x54   : > { %p2518_p7 = scmp.lt.s32.totalorder %s353_s2, %s2516_s7  ;;  %p2519_p6 = scmp.lt.s32.totalorder %s2517_s15, %s2510_s22 }
  0x55   : > { %p2514_p12 = pneg %p2513_p10 }
  0x56   : > { %p2520_p3 = por %p2519_p6, %p2518_p7 }
  0x58   : > { %p2521_p9 = pnand %p2520_p3, %p2514_p12 }
  0x5a   : > { %2524 = shalt.err (!%p2521_p9)
}
  0x5b   : > { %s3206_s1 = smov 4   ;;  %s3207_s25 = smov 64  }
  0x5c   : > { %2233 = dma.hbm_to_vmem [thread:$0]  (!%p2829_p11), %s351_s16, 128, %s353_s2, %s342_s3, %s3207_s25, %s3207_s25, %s3206_s1  }
  0x5d   : > { %364 = sbr.rel (%p2744_p8) target bundleno = 1411 (0x583), region = 56  ;;  %s2843_s26 = sand.u32 (!%p2744_p8), 1, %s2597_s10  }
  0x5e   : > { %s1950_s7 = sshll.u32 (!%p2744_p8), %s2843_s26, 3  ;;  %s367_s27 = scalar_lea.sflag (!%p2744_p8), [#allocation4], %s2843_s26 }
  0x5f   : > { %s370_s29 = scalar_lea.vmem (!%p2744_p8), [#allocation3], %s1950_s7 }
  0x62   : > { %2576 = dma.done.wait (%p2734_p4), %s367_s27, 128  }
  0x63   : > { %2578 = vsyncadd (%p2734_p4), %s367_s27, 4294967168 }
  0x64   : > { %2580 = dma.done.wait (%p2724_p1), [#allocation7], 512  }
  0x65   : > { %2582 = vsyncadd (%p2724_p1), [#allocation7], 4294966784 }
  0x66   : > { %2584 = dma.done.wait (%p2724_p1), [#allocation10], 512  }
  0x67   : > { %2586 = vsyncadd (%p2724_p1), [#allocation10], 4294966784  ;;  %v2622_v0 = vmov 0.0   ;;  %vm2623_vm0 = vmmov 0   ;;  %v2319_v1 = vld [vmem:[#allocation8 + $0x8] sm:$0xff]   ;;  %v2320_v2 = vld [vmem:[#allocation6 + $0x8] sm:$0xff]   ;;  %v434_v8 = vlaneseq }
  0x68   : > { %2077 = vmatprep.subr.bf16.mxu1 %v2622_v0  ;;  %2069 = vmatprep.subr.bf16.mxu0 %v2622_v0  ;;  %v2321_v3 = vld [vmem:[#allocation8] sm:$0xff]   ;;  %v2322_v4 = vld [vmem:[#allocation6] sm:$0xff]   ;;  %vm455_vm1 = vcmask 261120   ;;  %v2324_v6 = vld [vmem:[#allocation9 + $0x8] sm:$0xff]   ;;  %vm635_vm2 = vcmask 31744   ;;  %s2624_s21 = smov 120  }
  0x69   : > { %2081 = vmatprep.mubr.msk.bf16.mxu1 %vm2623_vm0, %v2622_v0  ;;  %2073 = vmatprep.mubr.msk.bf16.mxu0 %vm2623_vm0, %v2622_v0  ;;  %v2323_v5 = vld [vmem:[%s370_s29] sm:$0xff]   ;;  %v2325_v7 = vld [vmem:[#allocation9] sm:$0xff]   ;;  %v435_v9 = vshrl.u32 %v434_v8, 7  ;;  %v507_v10 = vld [vmem:[%s3181_s5] sm:$0x1]  ;;  %s2625_s16 = smov 124  }
  0x6a   : > { %2078 = vmatpush3.bf16.msra.mxu1 %v2319_v1  ;;  %2070 = vmatpush3.bf16.msra.mxu0 %v2320_v2  ;;  %v432_v11 = vld [vmem:[%s3180_s4] sm:$0x1]  ;;  %v508_v13 = vunpack.c.l.bf16 %v507_v10  ;;  %s2626_s18 = smov 116   ;;  %s2627_s22 = smov 112   ;;  %vm683_vm3 = vcmask 130048   ;;  %vm759_vm4 = vcmask 27648  }
  0x6b   : > { %2079 = vmatprep.subr.bf16.mxu1 %v2622_v0  ;;  %2071 = vmatprep.subr.bf16.mxu0 %v2622_v0  ;;  %v2886_v12 = vsub.s32 0, %v435_v9  ;;  %v433_v14 = vunpack.c.l.bf16 %v432_v11  ;;  %s2628_s24 = smov 108   ;;  %s2629_s15 = smov 104   ;;  %v573_v32 = vld [vmem:[%s3182_s6] sm:$0x1]  ;;  %vm898_vm5 = vcmask 60448  }
  0x6c   : > { %s2630_s1 = smov 100   ;;  %v574_v34 = vunpack.c.l.bf16 %v573_v32  ;;  %s2631_s27 = smov 4   ;;  %vm1034_vm6 = vcmask 93248   ;;  %vm1170_vm7 = vcmask 126048   ;;  %vm1306_vm8 = vcmask 158848  }
  0x6d   : > { %v512_v16 = vrot.slane %v508_v13, %v2886_v12  ;;  %v437_v17 = vrot.slane %v433_v14, %v2886_v12  ;;  %s2632_s29 = smov 8   ;;  %s2633_s2 = smov 12   ;;  %vm1442_vm9 = vcmask 191648   ;;  %vm1578_vm10 = vcmask 224448  }
  0x6e   : > { %2080 = vmatpush3.bf16.msra.mxu1 %v2321_v3  ;;  %2072 = vmatpush3.bf16.msra.mxu0 %v2322_v4  ;;  %v578_v36 = vrot.slane %v574_v34, %v2886_v12  ;;  %s2634_s3 = smov 16   ;;  %s2635_s17 = smov 20   ;;  %vm1714_vm11 = vcmask 257248  }
  0x6f   : > { %2093 = vmatprep.subr.bf16.mxu1 %v2622_v0  ;;  %2085 = vmatprep.subr.bf16.mxu0 %v2622_v0  ;;  %s2636_s19 = smov 24  }
  0x71   : > { %2082 = vmatmul.mubr.msk.bf16.vlgmr.msra.gmra.mxu1 %vm455_vm1, %v2323_v5  ;;  %2074 = vmatmul.mubr.msk.bf16.vlgmr.msra.gmra.mxu0 %vm455_vm1, %v2323_v5 }
  0x72   : > { %2095 = vmatprep.mubr.msk.bf16.mxu1 %vm2623_vm0, %v2622_v0  ;;  %2086 = vmatpush3.bf16.msra.mxu0 %v2324_v6 }
  0x73   : > { %2089 = vmatprep.mubr.msk.bf16.mxu0 %vm2623_vm0, %v2622_v0  ;;  %2087 = vmatprep.subr.bf16.mxu0 %v2622_v0 }
  0x76   : > { %2088 = vmatpush3.bf16.msra.mxu0 %v2325_v7 }
  0x77   : > { %2099 = vmatprep.subr.bf16.mxu0 %v2622_v0 }
  0x79   : > { %2090 = vmatmul.mubr.msk.bf16.vlgmr.msra.gmra.mxu0 %vm455_vm1, %v2323_v5 }
  0x7a   : > { %2101 = vmatprep.mubr.msk.bf16.mxu0 %vm2623_vm0, %v2622_v0 }
 0x131   : > { %v559_v15 = vpop.f32.mrf.mxu1  ;;  %v493_v18 = vpop.f32.mrf.mxu0 }
 0x132   : > { %v560_v22 = vadd.f32 %v559_v15, %v512_v16  ;;  %v494_v23 = vadd.f32 %v493_v18, %v437_v17 }
 0x133   : > { %v2083_v19 = vpop.f32.mrf.mxu1  ;;  %v2075_v20 = vpop.f32.mrf.mxu0 }
 0x135   : > { %v562_v21 = vpop.f32.mrf.mxu1  ;;  %v496_v25 = vpop.f32.mrf.mxu0 }
 0x136   : > { %v563_v24 = vadd.f32 %v562_v21, %v512_v16  ;;  %v497_v27 = vadd.f32 %v496_v25, %v437_v17 }
 0x137   : > { %v2084_v26 = vpop.f32.mrf.mxu1  ;;  %v2076_v29 = vpop.f32.mrf.mxu0 }
 0x138   : > { %v633_v28 = vpack.c.bf16 %v563_v24, %v560_v22  ;;  %v632_v30 = vpack.c.bf16 %v497_v27, %v494_v23 }
 0x139   : > { %v625_v33 = vpop.f32.mrf.mxu0 }
 0x13a   : > { %903 = vrot.lane.b32.xlu1 %v633_v28, %s2624_s21  ;;  %766 = vrot.lane.b32.xlu0 %v633_v28, %s2625_s16  ;;  %v640_v31 = vsel %vm635_vm2, %v633_v28, 0  ;;  %v626_v38 = vadd.f32 %v625_v33, %v578_v36 }
 0x13b   : > { %2094 = vmatpush3.bf16.xpose.msra.mxu1 %v640_v31  ;;  %v2091_v35 = vpop.f32.mrf.mxu0 }
 0x13c   : > { %2105 = vmatprep.subr.bf16.mxu1 %v2622_v0 }
 0x13d   : > { %v628_v37 = vpop.f32.mrf.mxu0 }
 0x13e   : > { %901 = vrot.lane.b32.xlu1 %v632_v30, %s2624_s21  ;;  %763 = vrot.lane.b32.xlu0 %v632_v30, %s2625_s16  ;;  %v629_v39 = vadd.f32 %v628_v37, %v578_v36 }
 0x13f   : > { %v2092_v40 = vpop.f32.mrf.mxu0 }
 0x140   : > { %v2913_v41 = vpack.c.bf16 %v629_v39, %v626_v38 }
 0x142   : > { %1037 = vrot.lane.b32.xlu1 %v632_v30, %s2626_s18  ;;  %1039 = vrot.lane.b32.xlu0 %v633_v28, %s2626_s18 }
 0x143   : > { %2096 = vmatmul.mubr.msk.bf16.vlgmr.msra.gmra.mxu1 %vm635_vm2, %v632_v30  ;;  %2100 = vmatpush3.bf16.msra.mxu0 %v2913_v41 }
 0x144   : > { %2107 = vmatprep.mubr.msk.bf16.mxu1 %vm2623_vm0, %v2622_v0  ;;  %2111 = vmatprep.subr.bf16.mxu0 %v2622_v0 }
 0x146   : > { %1173 = vrot.lane.b32.xlu1 %v632_v30, %s2627_s22  ;;  %1175 = vrot.lane.b32.xlu0 %v633_v28, %s2627_s22 }
 0x14a   : > { %1309 = vrot.lane.b32.xlu1 %v632_v30, %s2628_s24  ;;  %1311 = vrot.lane.b32.xlu0 %v633_v28, %s2628_s24 }
 0x14e   : > { %1445 = vrot.lane.b32.xlu1 %v632_v30, %s2629_s15  ;;  %1447 = vrot.lane.b32.xlu0 %v633_v28, %s2629_s15 }
 0x152   : > { %1581 = vrot.lane.b32.xlu1 %v632_v30, %s2630_s1  ;;  %1583 = vrot.lane.b32.xlu0 %v633_v28, %s2630_s1 }
 0x156   : > { %835 = vrot.lane.b32.xlu1 %v2913_v41, %s2625_s16  ;;  %971 = vrot.lane.b32.xlu0 %v2913_v41, %s2624_s21  ;;  %s2637_s21 = smov 28  }
 0x15a   : > { %1107 = vrot.lane.b32.xlu1 %v2913_v41, %s2626_s18 }
 0x1ac   : > { %v767_v42 = vpop.permute.xlu0 %766  ;;  %v904_v44 = vpop.permute.xlu1 %903 }
 0x1ad   : > { %v772_v43 = vsel %vm635_vm2, %v767_v42, 0  ;;  %v909_v46 = vsel %vm635_vm2, %v904_v44, 0 }
 0x1ae   : > { %2106 = vmatpush3.bf16.xpose.msra.mxu1 %v772_v43 }
 0x1af   : > { %2117 = vmatprep.subr.bf16.mxu1 %v2622_v0 }
 0x1b0   : > { %v764_v45 = vpop.permute.xlu0 %763  ;;  %v902_v48 = vpop.permute.xlu1 %901 }
 0x1b4   : > { %v1040_v47 = vpop.permute.xlu0 %1039  ;;  %v1038_v51 = vpop.permute.xlu1 %1037 }
 0x1b5   : > { %2108 = vmatmul.mubr.msk.bf16.vlgmr.msra.gmra.mxu1 %vm635_vm2, %v764_v45  ;;  %v1045_v49 = vsel %vm635_vm2, %v1040_v47, 0 }
 0x1b6   : > { %2118 = vmatpush3.bf16.xpose.msra.mxu1 %v909_v46  ;;  %2119 = vmatprep.mubr.msk.bf16.mxu1 %vm2623_vm0, %v2622_v0 }
 0x1b7   : > { %2129 = vmatprep.subr.bf16.mxu1 %v2622_v0 }
 0x1b8   : > { %v1176_v50 = vpop.permute.xlu0 %1175  ;;  %v1174_v54 = vpop.permute.xlu1 %1173 }
 0x1b9   : > { %v1181_v52 = vsel %vm635_vm2, %v1176_v50, 0 }
 0x1bc   : > { %v1312_v53 = vpop.permute.xlu0 %1311  ;;  %v1310_v57 = vpop.permute.xlu1 %1309 }
 0x1bd   : > { %2120 = vmatmul.mubr.msk.bf16.vlgmr.msra.gmra.mxu1 %vm635_vm2, %v902_v48  ;;  %v1317_v55 = vsel %vm635_vm2, %v1312_v53, 0 }
 0x1be   : > { %2130 = vmatpush3.bf16.xpose.msra.mxu1 %v1045_v49  ;;  %2131 = vmatprep.mubr.msk.bf16.mxu1 %vm2623_vm0, %v2622_v0 }
 0x1bf   : > { %2141 = vmatprep.subr.bf16.mxu1 %v2622_v0 }
 0x1c0   : > { %v1448_v56 = vpop.permute.xlu0 %1447  ;;  %v1446_v60 = vpop.permute.xlu1 %1445 }
 0x1c1   : > { %v1453_v58 = vsel %vm635_vm2, %v1448_v56, 0 }
 0x1c4   : > { %v1584_v59 = vpop.permute.xlu0 %1583  ;;  %v1582_v62 = vpop.permute.xlu1 %1581 }
 0x1c5   : > { %2132 = vmatmul.mubr.msk.bf16.vlgmr.msra.gmra.mxu1 %vm635_vm2, %v1038_v51  ;;  %v1589_v61 = vsel %vm635_vm2, %v1584_v59, 0 }
 0x1c6   : > { %2142 = vmatpush3.bf16.xpose.msra.mxu1 %v1181_v52  ;;  %2143 = vmatprep.mubr.msk.bf16.mxu1 %vm2623_vm0, %v2622_v0 }
 0x1c7   : > { %2153 = vmatprep.subr.bf16.mxu1 %v2622_v0 }
 0x1c8   : > { %v836_v21 = vpop.permute.xlu1 %835  ;;  %v2980_v23 = vpop.permute.xlu0 %971 }
 0x1cc   : > { %v2986_v27 = vpop.permute.xlu1 %1107 }
 0x1cd   : > { %2144 = vmatmul.mubr.msk.bf16.vlgmr.msra.gmra.mxu1 %vm635_vm2, %v1174_v54 }
 0x1ce   : > { %2154 = vmatpush3.bf16.xpose.msra.mxu1 %v1317_v55  ;;  %2155 = vmatprep.mubr.msk.bf16.mxu1 %vm2623_vm0, %v2622_v0 }
 0x1cf   : > { %2165 = vmatprep.subr.bf16.mxu1 %v2622_v0 }
 0x1d5   : > { %2156 = vmatmul.mubr.msk.bf16.vlgmr.msra.gmra.mxu1 %vm635_vm2, %v1310_v57 }
 0x1d6   : > { %2166 = vmatpush3.bf16.xpose.msra.mxu1 %v1453_v58  ;;  %2167 = vmatprep.mubr.msk.bf16.mxu1 %vm2623_vm0, %v2622_v0 }
 0x1d7   : > { %2177 = vmatprep.subr.bf16.mxu1 %v2622_v0 }
 0x1dd   : > { %2168 = vmatmul.mubr.msk.bf16.vlgmr.msra.gmra.mxu1 %vm635_vm2, %v1446_v60 }
 0x1de   : > { %2178 = vmatpush3.bf16.xpose.msra.mxu1 %v1589_v61  ;;  %2179 = vmatprep.mubr.msk.bf16.mxu1 %vm2623_vm0, %v2622_v0 }
 0x1df   : > { %2189 = vmatprep.subr.bf16.mxu1 %v2622_v0 }
 0x1e5   : > { %2180 = vmatmul.mubr.msk.bf16.vlgmr.msra.gmra.mxu1 %vm635_vm2, %v1582_v62 }
 0x1e6   : > { %2193 = vmatprep.mubr.msk.bf16.mxu1 %vm2623_vm0, %v2622_v0 }
 0x203   : > { %v676_v63 = vpop.f32.mrf.mxu1 }
 0x204   : > { %v684_v1 = vsel %vm683_vm3, %v676_v63, -inf }
 0x205   : > { %v2097_v2 = vpop.f32.mrf.mxu1  ;;  %685 = vmax.xlane.f32.xlu0 %v684_v1 }
 0x207   : > { %v679_v3 = vpop.f32.mrf.mxu1 }
 0x208   : > { %v687_v4 = vsel %vm683_vm3, %v679_v3, -inf }
 0x209   : > { %v2098_v5 = vpop.f32.mrf.mxu1  ;;  %688 = vmax.xlane.f32.xlu1 %v687_v4 }
 0x275   : > { %v2960_v6 = vpop.f32.mrf.mxu1 }
 0x276   : > { %v815_v7 = vsel %vm683_vm3, %v2960_v6, -inf }
 0x277   : > { %v2109_v8 = vpop.f32.mrf.mxu1  ;;  %816 = vmax.xlane.f32.xlu0 %v815_v7 }
 0x279   : > { %v2964_v9 = vpop.f32.mrf.mxu1 }
 0x27a   : > { %v818_v10 = vsel %vm683_vm3, %v2964_v9, -inf }
 0x27b   : > { %v2110_v11 = vpop.f32.mrf.mxu1  ;;  %819 = vmax.xlane.f32.xlu0 %v818_v10 }
 0x27d   : > { %v2968_v13 = vpop.f32.mrf.mxu1 }
 0x27e   : > { %v952_v14 = vsel %vm683_vm3, %v2968_v13, -inf }
 0x27f   : > { %v2121_v15 = vpop.f32.mrf.mxu1  ;;  %953 = vmax.xlane.f32.xlu1 %v952_v14 }
 0x281   : > { %v2972_v16 = vpop.f32.mrf.mxu1 }
 0x282   : > { %v955_v17 = vsel %vm683_vm3, %v2972_v16, -inf }
 0x283   : > { %v2122_v18 = vpop.f32.mrf.mxu1  ;;  %956 = vmax.xlane.f32.xlu0 %v955_v17 }
 0x285   : > { %v2976_v19 = vpop.f32.mrf.mxu1 }
 0x286   : > { %v1088_v20 = vsel %vm683_vm3, %v2976_v19, -inf }
 0x287   : > { %v2133_v22 = vpop.f32.mrf.mxu1  ;;  %1089 = vmax.xlane.f32.xlu1 %v1088_v20 }
 0x289   : > { %v2982_v24 = vpop.f32.mrf.mxu1 }
 0x28a   : > { %v1091_v25 = vsel %vm683_vm3, %v2982_v24, -inf }
 0x28b   : > { %v2134_v26 = vpop.f32.mrf.mxu1  ;;  %1092 = vmax.xlane.f32.xlu0 %v1091_v25 }
 0x28d   : > { %v2988_v28 = vpop.f32.mrf.mxu1 }
 0x28e   : > { %v686_v29 = vpop.xlane.xlu0 %685  ;;  %v1224_v30 = vsel %vm683_vm3, %v2988_v28, -inf }
 0x28f   : > { %v690_v31 = vsub.f32 %v676_v63, %v686_v29  ;;  %v2145_v32 = vpop.f32.mrf.mxu1  ;;  %1225 = vmax.xlane.f32.xlu1 %v1224_v30 }
 0x291   : > { %v2992_v33 = vpop.f32.mrf.mxu1  ;;  %v692_v34 = vmul.f32 1.442695, %v690_v31 }
 0x292   : > { %v689_v35 = vpop.xlane.xlu1 %688  ;;  %v1227_v36 = vsel %vm683_vm3, %v2992_v33, -inf }
 0x293   : > { %v691_v37 = vsub.f32 %v679_v3, %v689_v35  ;;  %v2146_v38 = vpop.f32.mrf.mxu1  ;;  %1228 = vmax.xlane.f32.xlu0 %v1227_v36  ;;  %2329 = vpow2.f32 %v692_v34 }
 0x295   : > { %v694_v39 = vmul.f32 1.442695, %v691_v37  ;;  %v2996_v40 = vpop.f32.mrf.mxu1 }
 0x296   : > { %v1360_v42 = vsel %vm683_vm3, %v2996_v40, -inf }
 0x297   : > { %2331 = vpow2.f32 %v694_v39  ;;  %v2157_v43 = vpop.f32.mrf.mxu1  ;;  %1361 = vmax.xlane.f32.xlu0 %v1360_v42 }
 0x299   : > { %v3000_v44 = vpop.f32.mrf.mxu1 }
 0x29a   : > { %v1363_v45 = vsel %vm683_vm3, %v3000_v44, -inf }
 0x29b   : > { %v2158_v46 = vpop.f32.mrf.mxu1  ;;  %1364 = vmax.xlane.f32.xlu0 %v1363_v45 }
 0x29d   : > { %v3004_v47 = vpop.f32.mrf.mxu1 }
 0x29e   : > { %v1496_v61 = vsel %vm683_vm3, %v3004_v47, -inf }
 0x29f   : > { %v2169_v48 = vpop.f32.mrf.mxu1 }
 0x2a0   : > { %1243 = vrot.lane.b32.xlu1 %v2913_v41, %s2627_s22  ;;  %v3012_v51 = vpop.eup %2329  ;;  %s1955_s22 = sshll.u32 %s2843_s26, 4 }
 0x2a1   : > { %v3008_v49 = vpop.f32.mrf.mxu1 }
 0x2a2   : > { %v1499_v50 = vsel %vm683_vm3, %v3008_v49, -inf }
 0x2a3   : > { %v2170_v52 = vpop.f32.mrf.mxu1  ;;  %1500 = vmax.xlane.f32.xlu0 %v1499_v50 }
 0x2a4   : > { %v3014_v53 = vpop.eup %2331 }
 0x2a5   : > { %v3016_v54 = vpop.f32.mrf.mxu1  ;;  %v702_v55 = vpack.c.bf16 %v3014_v53, %v3012_v51 }
 0x2a6   : > { %v1632_v56 = vsel %vm683_vm3, %v3016_v54, -inf }
 0x2a7   : > { %2102 = vmatmul.mubr.msk.bf16.vlgmr.msra.gmra.mxu0 %vm683_vm3, %v702_v55  ;;  %v2181_v57 = vpop.f32.mrf.mxu1  ;;  %1633 = vmax.xlane.f32.xlu0 %v1632_v56 }
 0x2a8   : > { %2112 = vmatpush3.bf16.msra.mxu0 %v836_v21  ;;  %2113 = vmatprep.mubr.msk.bf16.mxu0 %vm2623_vm0, %v2622_v0 }
 0x2a9   : > { %v3025_v58 = vpop.f32.mrf.mxu1  ;;  %2123 = vmatprep.subr.bf16.mxu0 %v2622_v0 }
 0x2aa   : > { %v1635_v59 = vsel %vm683_vm3, %v3025_v58, -inf }
 0x2ab   : > { %v2182_v60 = vpop.f32.mrf.mxu1  ;;  %1636 = vmax.xlane.f32.xlu0 %v1635_v59 }
 0x2c1   : > { %1379 = vrot.lane.b32.xlu0 %v2913_v41, %s2628_s24  ;;  %s420_s24 = scalar_lea.vmem [#allocation12], %s1955_s22 }
 0x2c4   : > { %1497 = vmax.xlane.f32.xlu1 %v1496_v61 }
 0x2d5   : > { %1515 = vrot.lane.b32.xlu1 %v2913_v41, %s2629_s15  ;;  %s1808_s15 = sshll.u32 %s420_s24, 4  ;;  %s3121_s15 = int_to_ptr.vmem [resolvable:$true] %s1808_s15 }
 0x2d9   : > { %1651 = vrot.lane.b32.xlu1 %v2913_v41, %s2630_s1  ;;  %s2024_s1 = sshll.u32 %s2605_s12, 8  ;;  %s2638_s12 = smov [#allocation12]  }
 0x300   : > { %v817_v62 = vpop.xlane.xlu0 %816 }
 0x301   : > { %v821_v63 = vsub.f32 %v2960_v6, %v817_v62 }
 0x303   : > { %v823_v1 = vmul.f32 1.442695, %v821_v63 }
 0x304   : > { %v820_v2 = vpop.xlane.xlu0 %819 }
 0x305   : > { %2333 = vpow2.f32 %v823_v1  ;;  %v822_v3 = vsub.f32 %v2964_v9, %v820_v2 }
 0x307   : > { %v825_v4 = vmul.f32 1.442695, %v822_v3 }
 0x308   : > { %v954_v5 = vpop.xlane.xlu1 %953 }
 0x309   : > { %2335 = vpow2.f32 %v825_v4  ;;  %v958_v7 = vsub.f32 %v2968_v13, %v954_v5 }
 0x30b   : > { %v960_v8 = vmul.f32 1.442695, %v958_v7 }
 0x30c   : > { %v957_v10 = vpop.xlane.xlu0 %956 }
 0x30d   : > { %2337 = vpow2.f32 %v960_v8  ;;  %v959_v11 = vsub.f32 %v2972_v16, %v957_v10 }
 0x30f   : > { %v962_v14 = vmul.f32 1.442695, %v959_v11  ;;  %v699_v11 = vsel %vm683_vm3, %v3014_v53, 0.0 }
 0x310   : > { %v1090_v41 = vpop.xlane.xlu1 %1089 }
 0x311   : > { %2339 = vpow2.f32 %v962_v14  ;;  %v1094_v6 = vsub.f32 %v2976_v19, %v1090_v41 }
 0x312   : > { %v2334_v15 = vpop.eup %2333 }
 0x313   : > { %v1096_v17 = vmul.f32 1.442695, %v1094_v6  ;;  %v827_v18 = vsel %vm683_vm3, %v2334_v15, 0.0 }
 0x314   : > { %v1093_v9 = vpop.xlane.xlu0 %1092  ;;  %828 = vadd.xlane.f32.xlu1 %v827_v18 }
 0x315   : > { %2341 = vpow2.f32 %v1096_v17  ;;  %v1095_v20 = vsub.f32 %v2982_v24, %v1093_v9 }
 0x316   : > { %v2336_v13 = vpop.eup %2335 }
 0x317   : > { %v1098_v21 = vmul.f32 1.442695, %v1095_v20  ;;  %v830_v22 = vsel %vm683_vm3, %v2336_v13, 0.0  ;;  %v833_v25 = vpack.c.bf16 %v2336_v13, %v2334_v15 }
 0x318   : > { %831 = vadd.xlane.f32.xlu0 %v830_v22  ;;  %v1226_v16 = vpop.xlane.xlu1 %1225  ;;  %v696_v22 = vsel %vm683_vm3, %v3012_v51, 0.0 }
 0x319   : > { %2343 = vpow2.f32 %v1098_v21  ;;  %v1230_v26 = vsub.f32 %v2988_v28, %v1226_v16  ;;  %2114 = vmatmul.mubr.msk.bf16.vlgmr.msra.gmra.mxu0 %vm683_vm3, %v833_v25 }
 0x31a   : > { %v2338_v19 = vpop.eup %2337  ;;  %2124 = vmatpush3.bf16.msra.mxu0 %v2980_v23  ;;  %2125 = vmatprep.mubr.msk.bf16.mxu0 %vm2623_vm0, %v2622_v0 }
 0x31b   : > { %v1232_v29 = vmul.f32 1.442695, %v1230_v26  ;;  %v964_v24 = vsel %vm683_vm3, %v2338_v19, 0.0  ;;  %2135 = vmatprep.subr.bf16.mxu0 %v2622_v0 }
 0x31c   : > { %v1229_v30 = vpop.xlane.xlu0 %1228  ;;  %965 = vadd.xlane.f32.xlu1 %v964_v24 }
 0x31d   : > { %2345 = vpow2.f32 %v1232_v29  ;;  %v1231_v31 = vsub.f32 %v2992_v33, %v1229_v30 }
 0x31e   : > { %v2340_v32 = vpop.eup %2339 }
 0x31f   : > { %v1234_v28 = vmul.f32 1.442695, %v1231_v31  ;;  %v967_v34 = vsel %vm683_vm3, %v2340_v32, 0.0  ;;  %v970_v35 = vpack.c.bf16 %v2340_v32, %v2338_v19 }
 0x320   : > { %v1362_v36 = vpop.xlane.xlu0 %1361  ;;  %968 = vadd.xlane.f32.xlu1 %v967_v34 }
 0x321   : > { %2347 = vpow2.f32 %v1234_v28  ;;  %v1366_v23 = vsub.f32 %v2996_v40, %v1362_v36  ;;  %2126 = vmatmul.mubr.msk.bf16.vlgmr.msra.gmra.mxu0 %vm683_vm3, %v970_v35 }
 0x322   : > { %v2342_v37 = vpop.eup %2341  ;;  %2136 = vmatpush3.bf16.msra.mxu0 %v2986_v27  ;;  %2137 = vmatprep.mubr.msk.bf16.mxu0 %vm2623_vm0, %v2622_v0  ;;  %v1244_v27 = vpop.permute.xlu1 %1243 }
 0x323   : > { %v1368_v38 = vmul.f32 1.442695, %v1366_v23  ;;  %v1100_v33 = vsel %vm683_vm3, %v2342_v37, 0.0  ;;  %2147 = vmatprep.subr.bf16.mxu0 %v2622_v0 }
 0x324   : > { %v1365_v39 = vpop.xlane.xlu0 %1364  ;;  %1101 = vadd.xlane.f32.xlu0 %v1100_v33 }
 0x325   : > { %2349 = vpow2.f32 %v1368_v38  ;;  %v1367_v42 = vsub.f32 %v3000_v44, %v1365_v39 }
 0x326   : > { %v2344_v43 = vpop.eup %2343 }
 0x327   : > { %v1370_v40 = vmul.f32 1.442695, %v1367_v42  ;;  %v1103_v45 = vsel %vm683_vm3, %v2344_v43, 0.0  ;;  %v1106_v46 = vpack.c.bf16 %v2344_v43, %v2342_v37 }
 0x328   : > { %1104 = vadd.xlane.f32.xlu1 %v1103_v45 }
 0x329   : > { %2351 = vpow2.f32 %v1370_v40  ;;  %2138 = vmatmul.mubr.msk.bf16.vlgmr.msra.gmra.mxu0 %vm683_vm3, %v1106_v46 }
 0x32a   : > { %v2346_v48 = vpop.eup %2345  ;;  %2148 = vmatpush3.bf16.msra.mxu0 %v1244_v27  ;;  %2149 = vmatprep.mubr.msk.bf16.mxu0 %vm2623_vm0, %v2622_v0 }
 0x32b   : > { %v1236_v50 = vsel %vm683_vm3, %v2346_v48, 0.0  ;;  %2159 = vmatprep.subr.bf16.mxu0 %v2622_v0 }
 0x32c   : > { %v1501_v44 = vpop.xlane.xlu0 %1500  ;;  %1237 = vadd.xlane.f32.xlu0 %v1236_v50 }
 0x32d   : > { %v1503_v52 = vsub.f32 %v3008_v49, %v1501_v44 }
 0x32e   : > { %v2348_v55 = vpop.eup %2347 }
 0x32f   : > { %v1506_v56 = vmul.f32 1.442695, %v1503_v52  ;;  %v1239_v57 = vsel %vm683_vm3, %v2348_v55, 0.0  ;;  %v1242_v59 = vpack.c.bf16 %v2348_v55, %v2346_v48 }
 0x330   : > { %v1634_v60 = vpop.xlane.xlu0 %1633  ;;  %1240 = vadd.xlane.f32.xlu1 %v1239_v57 }
 0x331   : > { %2353 = vpow2.f32 %v1506_v56  ;;  %2150 = vmatmul.mubr.msk.bf16.vlgmr.msra.gmra.mxu0 %vm683_vm3, %v1242_v59  ;;  %v1638_v14 = vsub.f32 %v3016_v54, %v1634_v60 }
 0x332   : > { %v2350_v61 = vpop.eup %2349  ;;  %2161 = vmatprep.mubr.msk.bf16.mxu0 %vm2623_vm0, %v2622_v0 }
 0x333   : > { %v1372_v62 = vsel %vm683_vm3, %v2350_v61, 0.0  ;;  %v1640_v15 = vmul.f32 1.442695, %v1638_v14 }
 0x334   : > { %v1637_v63 = vpop.xlane.xlu0 %1636  ;;  %1373 = vadd.xlane.f32.xlu0 %v1372_v62 }
 0x335   : > { %v1639_v49 = vsub.f32 %v3025_v58, %v1637_v63 }
 0x336   : > { %v2352_v1 = vpop.eup %2351 }
 0x337   : > { %v1642_v2 = vmul.f32 1.442695, %v1639_v49  ;;  %v1375_v3 = vsel %vm683_vm3, %v2352_v1, 0.0  ;;  %v1378_v5 = vpack.c.bf16 %v2352_v1, %v2350_v61 }
 0x338   : > { %v1380_v4 = vpop.permute.xlu0 %1379  ;;  %1376 = vadd.xlane.f32.xlu1 %v1375_v3 }
 0x339   : > { %2355 = vpow2.f32 %v1642_v2  ;;  %2160 = vmatpush3.bf16.msra.mxu0 %v1380_v4 }
 0x33a   : > { %2171 = vmatprep.subr.bf16.mxu0 %v2622_v0 }
 0x33c   : > { %2162 = vmatmul.mubr.msk.bf16.vlgmr.msra.gmra.mxu0 %vm683_vm3, %v1378_v5 }
 0x33d   : > { %2173 = vmatprep.mubr.msk.bf16.mxu0 %vm2623_vm0, %v2622_v0 }
 0x33e   : > { %v2354_v7 = vpop.eup %2353 }
 0x33f   : > { %v1511_v8 = vsel %vm683_vm3, %v2354_v7, 0.0 }
 0x340   : > { %1512 = vadd.xlane.f32.xlu1 %v1511_v8 }
 0x346   : > { %v2356_v58 = vpop.eup %2355 }
 0x347   : > { %v1647_v10 = vsel %vm683_vm3, %v2356_v58, 0.0 }
 0x348   : > { %1648 = vadd.xlane.f32.xlu1 %v1647_v10 }
 0x34c   : > { %700 = vadd.xlane.f32.xlu1 %v699_v11 }
 0x34d   : > { %v1498_v41 = vpop.xlane.xlu1 %1497 }
 0x34e   : > { %v1502_v6 = vsub.f32 %v3004_v47, %v1498_v41 }
 0x350   : > { %v1504_v17 = vmul.f32 1.442695, %v1502_v6 }
 0x351   : > { %v1516_v18 = vpop.permute.xlu1 %1515 }
 0x352   : > { %2357 = vpow2.f32 %v1504_v17  ;;  %2172 = vmatpush3.bf16.msra.mxu0 %v1516_v18 }
 0x353   : > { %2183 = vmatprep.subr.bf16.mxu0 %v2622_v0  ;;  %2359 = vpow2.f32 %v1640_v15 }
 0x355   : > { %v1652_v53 = vpop.permute.xlu1 %1651 }
 0x35f   : > { %v2358_v9 = vpop.eup %2357 }
 0x360   : > { %v1508_v20 = vsel %vm683_vm3, %v2358_v9, 0.0  ;;  %v1514_v13 = vpack.c.bf16 %v2354_v7, %v2358_v9  ;;  %v2360_v21 = vpop.eup %2359 }
 0x361   : > { %1509 = vadd.xlane.f32.xlu0 %v1508_v20  ;;  %v1644_v47 = vsel %vm683_vm3, %v2360_v21, 0.0  ;;  %v1650_v25 = vpack.c.bf16 %v2356_v58, %v2360_v21 }
 0x362   : > { %2174 = vmatmul.mubr.msk.bf16.vlgmr.msra.gmra.mxu0 %vm683_vm3, %v1514_v13 }
 0x363   : > { %2184 = vmatpush3.bf16.msra.mxu0 %v1652_v53  ;;  %2185 = vmatprep.mubr.msk.bf16.mxu0 %vm2623_vm0, %v2622_v0 }
 0x365   : > { %1645 = vadd.xlane.f32.xlu0 %v1644_v47 }
 0x367   : > { %v3093_v54 = vpop.f32.mrf.mxu0 }
 0x369   : > { %v2103_v16 = vpop.f32.mrf.mxu0  ;;  %697 = vadd.xlane.f32.xlu0 %v696_v22 }
 0x36a   : > { %2186 = vmatmul.mubr.msk.bf16.vlgmr.msra.gmra.mxu0 %vm683_vm3, %v1650_v25 }
 0x36b   : > { %v743_v26 = vpop.f32.mrf.mxu0 }
 0x36d   : > { %v2104_v19 = vpop.f32.mrf.mxu0 }
 0x39d   : > { %v829_v29 = vpop.xlane.xlu1 %828 }
 0x39e   : > { %2361 = vrcp.f32 %v829_v29 }
 0x3a1   : > { %v832_v34 = vpop.xlane.xlu0 %831 }
 0x3a2   : > { %2363 = vrcp.f32 %v832_v34 }
 0x3a5   : > { %v966_v24 = vpop.xlane.xlu1 %965 }
 0x3a6   : > { %2365 = vrcp.f32 %v966_v24 }
 0x3a9   : > { %v969_v30 = vpop.xlane.xlu1 %968 }
 0x3ab   : > { %v2362_v23 = vpop.eup %2361 }
 0x3ad   : > { %v1102_v37 = vpop.xlane.xlu0 %1101 }
 0x3af   : > { %v2364_v43 = vpop.eup %2363 }
 0x3b1   : > { %v1105_v31 = vpop.xlane.xlu1 %1104 }
 0x3b3   : > { %v2366_v48 = vpop.eup %2365 }
 0x3b5   : > { %v1238_v50 = vpop.xlane.xlu0 %1237 }
 0x3b9   : > { %v1241_v32 = vpop.xlane.xlu1 %1240 }
 0x3bd   : > { %v1374_v62 = vpop.xlane.xlu0 %1373 }
 0x3c1   : > { %v3098_v28 = vpop.xlane.xlu1 %1376 }
 0x3c9   : > { %v3100_v35 = vpop.xlane.xlu1 %1512 }
 0x3d1   : > { %v3102_v51 = vpop.xlane.xlu1 %1648 }
 0x3d5   : > { %v701_v36 = vpop.xlane.xlu1 %700 }
 0x3d6   : > { %2367 = vrcp.f32 %v701_v36 }
 0x3d7   : > { %2369 = vrcp.f32 %v969_v30 }
 0x3d8   : > { %2371 = vrcp.f32 %v1102_v37 }
 0x3d9   : > { %v875_v38 = vpop.f32.mrf.mxu0  ;;  %2373 = vrcp.f32 %v1105_v31 }
 0x3da   : > { %v884_v33 = vmul.f32 %v2362_v23, %v875_v38  ;;  %2375 = vrcp.f32 %v1238_v50  ;;  %v2327_v50 = vld [vmem:[#allocation11] sm:$0xff]  }
 0x3db   : > { %v2115_v39 = vpop.f32.mrf.mxu0  ;;  %2377 = vrcp.f32 %v1241_v32 }
 0x3dc   : > { %v2010_v42 = vpack.c.bf16 %v884_v33, %v884_v33  ;;  %2379 = vrcp.f32 %v1374_v62 }
 0x3dd   : > { %v878_v40 = vpop.f32.mrf.mxu0  ;;  %2381 = vrcp.f32 %v3098_v28 }
 0x3de   : > { %v885_v45 = vmul.f32 %v2364_v43, %v878_v40  ;;  %892 = vrot.lane.b32.xlu0 %v2010_v42, %s2631_s27 }
 0x3df   : > { %v2116_v46 = vpop.f32.mrf.mxu0 }
 0x3e0   : > { %v2011_v27 = vpack.c.bf16 %v885_v45, %v885_v45 }
 0x3e1   : > { %v1011_v44 = vpop.f32.mrf.mxu0 }
 0x3e2   : > { %v1020_v52 = vmul.f32 %v2366_v48, %v1011_v44  ;;  %894 = vrot.lane.b32.xlu1 %v2011_v27, %s2631_s27  ;;  %s3126_s27 = scalar_lea.hbm %s3185_s9, %s2024_s1 }
 0x3e3   : > { %v2368_v55 = vpop.eup %2367  ;;  %v2127_v56 = vpop.f32.mrf.mxu0 }
 0x3e4   : > { %v2012_v57 = vpack.c.bf16 %v1020_v52, %v1020_v52  ;;  %v750_v59 = vmul.f32 %v2368_v55, %v743_v26  ;;  %v2370_v60 = vpop.eup %2369 }
 0x3e5   : > { %v1014_v61 = vpop.f32.mrf.mxu0  ;;  %v2372_v3 = vpop.eup %2371 }
 0x3e6   : > { %v1021_v63 = vmul.f32 %v2370_v60, %v1014_v61  ;;  %1028 = vrot.lane.b32.xlu1 %v2012_v57, %s2632_s29  ;;  %v2009_v49 = vpack.c.bf16 %v750_v59, %v750_v59  ;;  %v2374_v10 = vpop.eup %2373 }
 0x3e7   : > { %v2128_v1 = vpop.f32.mrf.mxu0  ;;  %v2376_v17 = vpop.eup %2375 }
 0x3e8   : > { %v2013_v2 = vpack.c.bf16 %v1021_v63, %v1021_v63  ;;  %761 = vst.msk [vmem:[#allocation2 + $0x4] sm:$0xf] %vm759_vm4, %v2009_v49  ;;  %v2378_v53 = vpop.eup %2377 }
 0x3e9   : > { %v1147_v4 = vpop.f32.mrf.mxu0  ;;  %v2380_v26 = vpop.eup %2379 }
 0x3ea   : > { %v1156_v5 = vmul.f32 %v2372_v3, %v1147_v4  ;;  %v1510_v7 = vpop.xlane.xlu0 %1509  ;;  %1030 = vrot.lane.b32.xlu0 %v2013_v2, %s2632_s29  ;;  %v2382_v30 = vpop.eup %2381 }
 0x3eb   : > { %v2139_v8 = vpop.f32.mrf.mxu0 }
 0x3ec   : > { %v2014_v58 = vpack.c.bf16 %v1156_v5, %v1156_v5 }
 0x3ed   : > { %v1150_v11 = vpop.f32.mrf.mxu0 }
 0x3ee   : > { %v1157_v14 = vmul.f32 %v2374_v10, %v1150_v11  ;;  %v1646_v41 = vpop.xlane.xlu0 %1645  ;;  %1164 = vrot.lane.b32.xlu1 %v2014_v58, %s2633_s2 }
 0x3ef   : > { %v2140_v6 = vpop.f32.mrf.mxu0 }
 0x3f0   : > { %v2015_v15 = vpack.c.bf16 %v1157_v14, %v1157_v14  ;;  %v1725_v6 = vld [vmem:[%s3184_s8] sm:$0x1] }
 0x3f1   : > { %v1283_v18 = vpop.f32.mrf.mxu0 }
 0x3f2   : > { %v1292_v9 = vmul.f32 %v2376_v17, %v1283_v18  ;;  %v698_v20 = vpop.xlane.xlu0 %697  ;;  %1166 = vrot.lane.b32.xlu0 %v2015_v15, %s2633_s2  ;;  %v1726_v15 = vunpack.c.l.bf16 %v1725_v6  ;;  %s1795_s2 = scalar_lea.sflag [#allocation5], %s2843_s26 }
 0x3f3   : > { %2383 = vrcp.f32 %v698_v20  ;;  %v2151_v13 = vpop.f32.mrf.mxu0 }
 0x3f4   : > { %v2016_v21 = vpack.c.bf16 %v1292_v9, %v1292_v9  ;;  %2385 = vrcp.f32 %v1510_v7  ;;  %v1730_v17 = vrot.slane %v1726_v15, %v2886_v12 }
 0x3f5   : > { %v1286_v47 = vpop.f32.mrf.mxu0  ;;  %2387 = vrcp.f32 %v3100_v35 }
 0x3f6   : > { %v1293_v22 = vmul.f32 %v2378_v53, %v1286_v47  ;;  %1300 = vrot.lane.b32.xlu1 %v2016_v21, %s2634_s3  ;;  %2389 = vrcp.f32 %v1646_v41 }
 0x3f7   : > { %v2152_v25 = vpop.f32.mrf.mxu0  ;;  %2391 = vrcp.f32 %v3102_v51 }
 0x3f8   : > { %v2017_v16 = vpack.c.bf16 %v1293_v22, %v1293_v22 }
 0x3fa   : > { %1302 = vrot.lane.b32.xlu0 %v2017_v16, %s2634_s3  ;;  %s2525_s3 = scalar_lea.vmem %s3121_s15, 256 }
 0x3fb   : > { %p2526_p1 = scmp.ne.s32.totalorder %s3121_s15, %s2525_s3 }
 0x3fc   : > { %v1419_v19 = vpop.f32.mrf.mxu0 }
 0x3fd   : > { %v1428_v29 = vmul.f32 %v2380_v26, %v1419_v19  ;;  %p2527_p4 = pnand %p2526_p1, %p2813_p0 }
 0x3fe   : > { %v2163_v24 = vpop.f32.mrf.mxu0 }
 0x3ff   : > { %v2018_v31 = vpack.c.bf16 %v1428_v29, %v1428_v29  ;;  %p2528_p8 = pneg %p2527_p4 }
 0x400   : > { %v2384_v32 = vpop.eup %2383  ;;  %v1422_v28 = vpop.f32.mrf.mxu0 }
 0x401   : > { %v1429_v34 = vmul.f32 %v2382_v30, %v1422_v28  ;;  %1436 = vrot.lane.b32.xlu1 %v2018_v31, %s2635_s17  ;;  %v749_v36 = vmul.f32 %v2384_v32, %v3093_v54  ;;  %v2386_v33 = vpop.eup %2385  ;;  %v2326_v54 = vld [vmem:[#allocation11 + $0x8] sm:$0xff]  }
 0x402   : > { %v2164_v23 = vpop.f32.mrf.mxu0  ;;  %v2388_v45 = vpop.eup %2387  ;;  %2190 = vmatpush3.bf16.msra.mxu1 %v2326_v54 }
 0x403   : > { %v2019_v37 = vpack.c.bf16 %v1429_v34, %v1429_v34  ;;  %v2008_v38 = vpack.c.bf16 %v749_v36, %v749_v36  ;;  %2191 = vmatprep.subr.bf16.mxu1 %v2622_v0  ;;  %v2390_v35 = vpop.eup %2389 }
 0x404   : > { %v2392_v57 = vpop.eup %2391 }
 0x405   : > { %1438 = vrot.lane.b32.xlu0 %v2019_v37, %s2635_s17  ;;  %760 = vst.msk [vmem:[#allocation2] sm:$0xf] %vm759_vm4, %v2008_v38  ;;  %s2529_s17 = sshll.u32 %s2638_s12, 4  ;;  %s2530_s17 = int_to_ptr.vmem [resolvable:$false] %s2529_s17 }
 0x406   : > { %2192 = vmatpush3.bf16.msra.mxu1 %v2327_v50  ;;  %p2532_p13 = scmp.lt.s32.totalorder %s3121_s15, %s2530_s17 }
 0x422   : > { %v1555_v39 = vpop.f32.mrf.mxu0 }
 0x423   : > { %v1564_v42 = vmul.f32 %v2386_v33, %v1555_v39 }
 0x424   : > { %v2175_v43 = vpop.f32.mrf.mxu0 }
 0x425   : > { %v2020_v40 = vpack.c.bf16 %v1564_v42, %v1564_v42 }
 0x426   : > { %v1558_v46 = vpop.f32.mrf.mxu0 }
 0x427   : > { %v1565_v27 = vmul.f32 %v2388_v45, %v1558_v46  ;;  %1572 = vrot.lane.b32.xlu1 %v2020_v40, %s2636_s19 }
 0x428   : > { %v2176_v48 = vpop.f32.mrf.mxu0 }
 0x429   : > { %v2021_v44 = vpack.c.bf16 %v1565_v27, %v1565_v27 }
 0x42a   : > { %v1691_v52 = vpop.f32.mrf.mxu0 }
 0x42b   : > { %v1700_v51 = vmul.f32 %v2390_v35, %v1691_v52  ;;  %1574 = vrot.lane.b32.xlu0 %v2021_v44, %s2636_s19  ;;  %s2531_s19 = scalar_lea.vmem %s2530_s17, 512 }
 0x42c   : > { %v2187_v55 = vpop.f32.mrf.mxu0  ;;  %p2533_p11 = scmp.lt.s32.totalorder %s2531_s19, %s2525_s3 }
 0x42d   : > { %v2022_v56 = vpack.c.bf16 %v1700_v51, %v1700_v51 }
 0x42e   : > { %v1694_v59 = vpop.f32.mrf.mxu0  ;;  %p2534_p2 = por %p2533_p11, %p2532_p13 }
 0x42f   : > { %v1701_v60 = vmul.f32 %v2392_v57, %v1694_v59  ;;  %1708 = vrot.lane.b32.xlu1 %v2022_v56, %s2637_s21 }
 0x430   : > { %v2188_v61 = vpop.f32.mrf.mxu0  ;;  %p2535_p5 = pnand %p2534_p2, %p2528_p8 }
 0x431   : > { %v2023_v62 = vpack.c.bf16 %v1701_v60, %v1701_v60 }
 0x433   : > { %1710 = vrot.lane.b32.xlu0 %v2023_v62, %s2637_s21 }
 0x450   : > { %v893_v63 = vpop.permute.xlu0 %892 }
 0x451   : > { %899 = vst.msk [vmem:[#allocation2] sm:$0xf] %vm898_vm5, %v893_v63 }
 0x454   : > { %v895_v49 = vpop.permute.xlu1 %894 }
 0x455   : > { %900 = vst.msk [vmem:[#allocation2 + $0x4] sm:$0xf] %vm898_vm5, %v895_v49 }
 0x458   : > { %v1029_v0 = vpop.permute.xlu1 %1028 }
 0x459   : > { %1035 = vst.msk [vmem:[#allocation2] sm:$0xf] %vm1034_vm6, %v1029_v0 }
 0x45c   : > { %v1031_v1 = vpop.permute.xlu0 %1030 }
 0x45d   : > { %1036 = vst.msk [vmem:[#allocation2 + $0x4] sm:$0xf] %vm1034_vm6, %v1031_v1 }
 0x460   : > { %v1165_v2 = vpop.permute.xlu1 %1164 }
 0x461   : > { %1171 = vst.msk [vmem:[#allocation2] sm:$0xf] %vm1170_vm7, %v1165_v2 }
 0x464   : > { %v1167_v3 = vpop.permute.xlu0 %1166 }
 0x465   : > { %1172 = vst.msk [vmem:[#allocation2 + $0x4] sm:$0xf] %vm1170_vm7, %v1167_v3 }
 0x468   : > { %v1301_v4 = vpop.permute.xlu1 %1300 }
 0x469   : > { %1307 = vst.msk [vmem:[#allocation2] sm:$0xf] %vm1306_vm8, %v1301_v4 }
 0x46c   : > { %v1303_v5 = vpop.permute.xlu0 %1302 }
 0x46d   : > { %1308 = vst.msk [vmem:[#allocation2 + $0x4] sm:$0xf] %vm1306_vm8, %v1303_v5 }
 0x473   : > { %v1437_v7 = vpop.permute.xlu1 %1436 }
 0x474   : > { %1443 = vst.msk [vmem:[#allocation2] sm:$0xf] %vm1442_vm9, %v1437_v7 }
 0x477   : > { %v1439_v8 = vpop.permute.xlu0 %1438 }
 0x478   : > { %1444 = vst.msk [vmem:[#allocation2 + $0x4] sm:$0xf] %vm1442_vm9, %v1439_v8 }
 0x499   : > { %v1573_v58 = vpop.permute.xlu1 %1572 }
 0x49a   : > { %1579 = vst.msk [vmem:[#allocation2] sm:$0xf] %vm1578_vm10, %v1573_v58 }
 0x49d   : > { %v1575_v10 = vpop.permute.xlu0 %1574 }
 0x49e   : > { %1580 = vst.msk [vmem:[#allocation2 + $0x4] sm:$0xf] %vm1578_vm10, %v1575_v10 }
 0x4a1   : > { %v1709_v11 = vpop.permute.xlu1 %1708 }
 0x4a2   : > { %1715 = vst.msk [vmem:[#allocation2] sm:$0xf] %vm1714_vm11, %v1709_v11 }
 0x4a5   : > { %v1711_v14 = vpop.permute.xlu0 %1710 }
 0x4a6   : > { %1716 = vst.msk [vmem:[#allocation2 + $0x4] sm:$0xf] %vm1714_vm11, %v1711_v14 }
 0x4ad   : > { %v2328_v41 = vld [vmem:[#allocation2] sm:$0xff]  }
 0x4ae   : > { %2194 = vmatmul.mubr.msk.bf16.vlgmr.msra.gmra.mxu1 %vm455_vm1, %v2328_v41 }
 0x56e   : > { %v1785_v18 = vpop.f32.mrf.mxu1 }
 0x56f   : > { %v1786_v9 = vadd.f32 %v1785_v18, %v1730_v17 }
 0x570   : > { %v2195_v20 = vpop.f32.mrf.mxu1 }
 0x571   : > { %1792 = vst.msk [vmem:[%s420_s24] sm:$0xff] %vm455_vm1, %v1786_v9 }
 0x572   : > { %v1788_v13 = vpop.f32.mrf.mxu1 }
 0x573   : > { %v1789_v21 = vadd.f32 %v1788_v13, %v1730_v17 }
 0x574   : > { %v2196_v12 = vpop.f32.mrf.mxu1 }
 0x575   : > { %1793 = vst.msk [vmem:[%s420_s24 + $0x8] sm:$0xff] %vm455_vm1, %v1789_v21 }
 0x576   : > { %2538 = shalt.err (!%p2535_p5)
}
 0x577   : > { %s2539_s21 = scalar_lea.hbm %s3126_s27, 256  ;;  %s2543_s22 = scalar_lea.hbm %s3185_s9, 512 }
 0x578   : > { %p2540_p10 = scmp.ne.s32.totalorder %s3126_s27, %s2539_s21  ;;  %p2544_p6 = scmp.lt.s32.totalorder %s3126_s27, %s3185_s9 }
 0x579   : > { %p2545_p3 = scmp.lt.s32.totalorder %s2543_s22, %s2539_s21 }
 0x57a   : > { %p2541_p12 = pnand %p2540_p10, %p2813_p0 }
 0x57b   : > { %p2546_p9 = por %p2545_p3, %p2544_p6 }
 0x57c   : > { %p2542_p7 = pneg %p2541_p12 }
 0x57e   : > { %p2547_p1 = pnand %p2546_p9, %p2542_p7 }
 0x580   : > { %2550 = shalt.err (!%p2547_p1)
}
 0x581   : > { %s2639_s25 = smov 128  }
 0x582   : > { %2215 = dma.vmem_to_hbm [thread:$0]  (%p2813_p0), %s3121_s15, 256, %s3126_s27, %s1795_s2, %s2639_s25, %s2639_s25, %s2632_s29  }
 0x583 PF: > { %s3208_s7 = sld [smem:[#allocation17_spill]]  ;;  %s1823_s3 = sand.u32 1, %s2593_s30  }
 0x584   : > { %p3210_p8 = scmp.ge.s32.totalorder %s2613_s14, 2  ;;  %s1824_s12 = scalar_lea.sflag [#allocation5], %s1823_s3 }
 0x589   : > { %p3209_p4 = scmp.ne.s32.totalorder %s3208_s7, 0 }
 0x58b   : > { %p2235_p13 = pnand %p3210_p8, %p3209_p4 }
 0x58d   : > { %p2236_p11 = pneg %p2235_p13 }
 0x58f   : > { %2588 = dma.done.wait (%p2236_p11), %s1824_s12, 256  }
 0x590   : > { %2590 = vsyncadd (%p2236_p11), %s1824_s12, 4294967040  ;;  %s27_s14 = sadd.s32 1, %s2613_s14   ;;  %s3211_s30 = smov %s2597_s10 }
 0x591   : > { %p24_p2 = scmp.ge.s32.totalorder %s27_s14, 4   ;;  %s3212_s10 = smov %s2601_s11 }
 0x592   : > { %s3213_s11 = smov %s2822_s28  ;;  %s3214_s12 = smov %s2609_s13 }
 0x593   : > { %s3215_s13 = smov %s3217_s23  ;;  %26 = sbr.rel (!%p24_p2) target bundleno = 13 (0xd), region = 124 }
 0x598   :  { %1829 = vsyncpa [#allocation4], 1 }
 0x599   :  { %1831 = vsyncpa [#allocation4 + $0x1], 1 }
 0x59a   :  { %1832 = vsyncpa [#allocation7], 1 }
 0x59b   :  { %1833 = vsyncpa [#allocation10], 1 }
 0x59c   :  { %1834 = vsyncpa [#allocation5], 1 }
 0x59d   :  { %1836 = vsyncpa [#allocation5 + $0x1], 1 }

</bundles_post_ra>
